<compile_context>
chip_gen: v7x
topology: tpu7x:2x2x1
jax: 0.10.0
libtpu: 0.0.40
codegen_flags: <defaults>
</compile_context>

<pallas_src>
import functools

import jax
import jax.numpy as jnp
from jax import lax
from jax.experimental import pallas as pl
from jax.experimental.pallas import tpu as pltpu

# Sized for v7x (64 MiB physical / 32 MiB default scoped VMEM); also safe on
# v5e / v6e (128 MiB parts).
_VMEM_LIMIT = 32 * 1024 * 1024


def _round_up(x, m):
    return ((x + m - 1) // m) * m


def _pick_block(total, target, align=1):
    """Largest divisor of `total` that is <= target and a multiple of `align`
    (falls back to the full extent, which always satisfies BlockSpec rules)."""
    target = max(1, min(total, target))
    if total <= target:
        return total
    for d in range(target, 0, -1):
        if total % d == 0 and d % align == 0:
            return d
    return total


# ---------------------------------------------------------------------------
# Kernel 1: RNN recurrence. Batch-block grid; only the h2h matmul in the loop.
# ---------------------------------------------------------------------------
def _rnn_kernel(
    emb_ref,                 # (T, Bb, E)  f32   (time-major input block)
    wi_t_ref,                # (E, H)      bf16  (pre-transposed i2h weight)
    wh_t_ref,                # (H, H)      f32   (pre-transposed h2h weight)
    wro_t_ref,               # (H, H)      bf16  (pre-transposed rnn-out weight)
    b_ih_ref,                # (1, H)      f32   (bi + bh fused)
    bro_ref,                 # (1, H)      f32
    hs_ref,                  # (Bb, T, H)  f32  out (batch-major)
    ys_ref,                  # (Bb, T, H)  f32  out (batch-major)
    h_tm_ref,                # (T, Bb, H)  f32  scratch (time-major staging)
    *,
    unroll,
):
    T, Bb, E = emb_ref.shape
    H = hs_ref.shape[-1]

    # ---- hoisted i2h projection: one big bf16 matmul, f32 accumulation ----
    # emb arrives time-major, so the flatten merges Bb into the sublane dim
    # (layout-free whenever Bb % 8 == 0; Bb is chosen that way at real B).
    emb_flat = emb_ref[...].reshape(T * Bb, E).astype(jnp.bfloat16)
    pre = (
        jnp.dot(emb_flat, wi_t_ref[...], preferred_element_type=jnp.float32)
        + b_ih_ref[...]
    )
    h_tm_ref[...] = pre.reshape(T, Bb, H)

    # Recurrence kept in f32 (h and wh) to preserve accuracy of the serial chain.
    wh_t = wh_t_ref[...]

    # ---- serial recurrence: only h2h matmul + add + ReLU per step ----
    def body(t, h_prev):
        p = h_tm_ref[t] + jnp.dot(
            h_prev, wh_t, preferred_element_type=jnp.float32
        )
        h = jnp.maximum(p, 0.0)
        h_tm_ref[t] = h
        return h

    # Bounded unroll: LLO scheduling visibility without vreg-pressure blowup.
    lax.fori_loop(0, T, body, jnp.zeros((Bb, H), jnp.float32), unroll=unroll)

    # ---- single in-VMEM relayout: time-major -> batch-major outputs ----
    h_bm = jnp.transpose(h_tm_ref[...], (1, 0, 2))        # (Bb, T, H)
    hs_ref[...] = h_bm

    # ---- hoisted output projection: bf16 MXU, f32 accumulation ----
    # (Bb, T, H) -> (Bb*T, H) is layout-free when T % 8 == 0.
    h_flat = h_bm.reshape(Bb * T, H).astype(jnp.bfloat16)
    ys = (
        jnp.dot(h_flat, wro_t_ref[...], preferred_element_type=jnp.float32)
        + bro_ref[...]
    )
    ys_ref[...] = ys.reshape(Bb, T, H)


# ---------------------------------------------------------------------------
# Kernel 2: causal self-attention, batch-major, one batch block per program.
# ---------------------------------------------------------------------------
def _attn_kernel(
    ys_ref,                  # (Bb, T, H) f32
    wq_t_ref, bq_ref,        # (H, K) bf16, (1, K) f32
    wk_t_ref, bk_ref,        # (H, K) bf16, (1, K) f32
    wv_t_ref, bv_ref,        # (H, Vd) bf16, (1, Vd) f32
    wao_t_ref, bao_ref,      # (Vd, H) bf16, (1, H) f32
    attn_out_ref,            # (Bb, T, H) bf16 out
    *,
    key_dim,
):
    Bb, T, H = ys_ref.shape

    # Flat lane-dense 2-D projections (M = Bb*T rows), bf16 MXU, f32 acc.
    y_flat = ys_ref[...].reshape(Bb * T, H).astype(jnp.bfloat16)
    scale = 1.0 / (float(key_dim) ** 0.5)

    q = (
        jnp.dot(y_flat, wq_t_ref[...], preferred_element_type=jnp.float32)
        + bq_ref[...]
    ) * scale
    k = (
        jnp.dot(y_flat, wk_t_ref[...], preferred_element_type=jnp.float32)
        + bk_ref[...]
    )
    v = (
        jnp.dot(y_flat, wv_t_ref[...], preferred_element_type=jnp.float32)
        + bv_ref[...]
    )

    K = q.shape[-1]
    Vd = v.shape[-1]
    # bf16 inputs for the two O(Bb*T^2) matmuls (f32 accumulation on the MXU).
    q = q.reshape(Bb, T, K).astype(jnp.bfloat16)
    k = k.reshape(Bb, T, K).astype(jnp.bfloat16)
    v = v.reshape(Bb, T, Vd).astype(jnp.bfloat16)

    # Batch-major scores (no hidden time<->batch relayout in the contraction).
    # NOTE: for very long T the key axis should be tiled with an online-softmax
    # (flash) inner loop; at these sizes the (Bb,T,T) tensor fits VMEM.
    scores = jnp.einsum(
        "btk,bsk->bts", q, k, preferred_element_type=jnp.float32
    )  # (Bb, T, T)

    q_pos = lax.broadcasted_iota(jnp.int32, (1, T, T), 1)
    s_pos = lax.broadcasted_iota(jnp.int32, (1, T, T), 2)
    scores = jnp.where(s_pos <= q_pos, scores, -jnp.inf)

    # Softmax with EUP approximate reciprocal instead of VALU division.
    m = jnp.max(scores, axis=-1, keepdims=True)
    e = jnp.exp(scores - m)
    w = (
        e * pl.reciprocal(jnp.sum(e, axis=-1, keepdims=True), approx=True)
    ).astype(jnp.bfloat16)

    attn = jnp.einsum(
        "bts,bsv->btv", w, v, preferred_element_type=jnp.float32
    )  # (Bb, T, Vd)

    attn_flat = attn.reshape(Bb * T, Vd).astype(jnp.bfloat16)
    out = (
        jnp.dot(attn_flat, wao_t_ref[...], preferred_element_type=jnp.float32)
        + bao_ref[...]
    )
    # Emit bf16 directly: halves writeback and feeds the LM head without a cast.
    attn_out_ref[...] = out.reshape(Bb, T, H).astype(attn_out_ref.dtype)


# ---------------------------------------------------------------------------
# Kernel 3: LM head. Vocab axis outer -> wlm streamed from HBM exactly once.
# ---------------------------------------------------------------------------
def _lm_head_kernel(x_ref, wlm_t_ref, blm_ref, out_ref):
    # x is already bf16 (attention kernel output); f32 accumulation on the MXU.
    out_ref[...] = (
        jnp.dot(x_ref[...], wlm_t_ref[...], preferred_element_type=jnp.float32)
        + blm_ref[...]
    )


# ---------------------------------------------------------------------------
# Wrapper
# ---------------------------------------------------------------------------
def rnn_lm_forward(tokens, params):
    """tokens: (B, T) int32. Returns (logits, hidden_states, rnn_outputs)
    with PyTorch-convention shapes (B, T, V), (B, T, H), (B, T, H)."""
    B, T = tokens.shape
    embed_table = params["embed"]                   # (vocab, E)
    E = embed_table.shape[1]
    H = params["wi"].shape[0]
    Kd = params["wq"].shape[0]
    Vd = params["wv"].shape[0]
    V = params["wlm"].shape[0]

    # ---- embedding lookup (glue). Gathering with tokens.T produces the
    # time-major layout the recurrence wants at ZERO extra HBM passes.
    emb_tm = jnp.take(embed_table, tokens.T, axis=0).astype(jnp.float32)  # (T,B,E)

    # Pre-transposed weights + fused recurrence bias. wh/h stay f32 (accuracy
    # of the serial chain); the two hoisted big matmuls use bf16 MXU inputs.
    wi_t = params["wi"].T.astype(jnp.bfloat16)       # (E, H)
    wh_t = params["wh"].T.astype(jnp.float32)        # (H, H)
    wro_t = params["wro"].T.astype(jnp.bfloat16)     # (H, H)
    b_ih = (params["bi"] + params["bh"]).astype(jnp.float32)   # (1, H)
    bro = params["bro"].astype(jnp.float32)

    # Batch block for the recurrence: multiple of 8 (sublane dim of the
    # time-major emb block) when tiling, capped so blocks stay VMEM-friendly.
    Bb_rnn = _pick_block(B, 128, align=8)
    nb = B // Bb_rnn

    hidden_states, rnn_outputs = pl.pallas_call(
        functools.partial(_rnn_kernel, unroll=min(8, T)),
        out_shape=(
            jax.ShapeDtypeStruct((B, T, H), jnp.float32),
            jax.ShapeDtypeStruct((B, T, H), jnp.float32),
        ),
        grid=(nb,),
        in_specs=[
            pl.BlockSpec((T, Bb_rnn, E), lambda b: (0, b, 0)),
            pl.BlockSpec((E, H), lambda b: (0, 0)),
            pl.BlockSpec((H, H), lambda b: (0, 0)),
            pl.BlockSpec((H, H), lambda b: (0, 0)),
            pl.BlockSpec((1, H), lambda b: (0, 0)),
            pl.BlockSpec((1, H), lambda b: (0, 0)),
        ],
        out_specs=(
            pl.BlockSpec((Bb_rnn, T, H), lambda b: (b, 0, 0)),
            pl.BlockSpec((Bb_rnn, T, H), lambda b: (b, 0, 0)),
        ),
        scratch_shapes=[pltpu.VMEM((T, Bb_rnn, H), jnp.float32)],
        compiler_params=pltpu.CompilerParams(
            dimension_semantics=("parallel",),
            vmem_limit_bytes=_VMEM_LIMIT,
        ),
    )(emb_tm, wi_t, wh_t, wro_t, b_ih, bro)

    # ---- attention: batch-major, grid over batch blocks ("parallel") ----
    # Aim for >=4 grid steps (>=2 per core on v7x) and cap the block so the
    # (Bb,T,T) score/exp/weight tensors stay well inside VMEM.
    scores_bytes = max(1, T * T * 4 * 3)
    bb_cap = max(1, (8 * 1024 * 1024) // scores_bytes)
    bb_target = max(1, min(bb_cap, (B + 3) // 4))
    B_blk = _pick_block(B, bb_target)
    grid_b = B // B_blk

    wq_t = params["wq"].T.astype(jnp.bfloat16)        # (H, Kd)
    wk_t = params["wk"].T.astype(jnp.bfloat16)        # (H, Kd)
    wv_t = params["wv"].T.astype(jnp.bfloat16)        # (H, Vd)
    wao_t = params["wao"].T.astype(jnp.bfloat16)      # (Vd, H)
    bq = params["bq"].astype(jnp.float32)
    bk = params["bk"].astype(jnp.float32)
    bv = params["bv"].astype(jnp.float32)
    bao = params["bao"].astype(jnp.float32)

    const = lambda shape: pl.BlockSpec(shape, lambda b: (0, 0))
    attn_out = pl.pallas_call(
        functools.partial(_attn_kernel, key_dim=Kd),
        out_shape=jax.ShapeDtypeStruct((B, T, H), jnp.bfloat16),
        grid=(grid_b,),
        in_specs=[
            pl.BlockSpec((B_blk, T, H), lambda b: (b, 0, 0)),
            const((H, Kd)), const((1, Kd)),
            const((H, Kd)), const((1, Kd)),
            const((H, Vd)), const((1, Vd)),
            const((Vd, H)), const((1, H)),
        ],
        out_specs=pl.BlockSpec((B_blk, T, H), lambda b: (b, 0, 0)),
        compiler_params=pltpu.CompilerParams(
            dimension_semantics=("parallel",),
            vmem_limit_bytes=_VMEM_LIMIT,
        ),
    )(rnn_outputs, wq_t, bq, wk_t, bk, wv_t, bv, wao_t, bao)

    # ---- LM head: vocab-outer grid, padded tiles (no whole-array fallback) ----
    M = B * T
    attn_flat = attn_out.reshape(M, H)                 # bf16, layout-free (T%8==0)
    wlm_t = params["wlm"].T.astype(jnp.bfloat16)       # (H, V)
    blm = params["blm"].astype(jnp.float32)            # (1, V)

    # On 128 MiB parts (v5e/v6e) tm/tv could be raised (~512/1024+) to amortize
    # per-grid-step overhead; kept at 256/512 so the same tiling is spill-free
    # on v7x's 64 MiB VMEM.
    tm = min(256, _round_up(M, 8))
    tv = min(512, _round_up(V, 128))
    M_pad = _round_up(M, tm)
    V_pad = _round_up(V, tv)
    if M_pad != M:
        attn_flat = jnp.pad(attn_flat, ((0, M_pad - M), (0, 0)))
    if V_pad != V:
        wlm_t = jnp.pad(wlm_t, ((0, 0), (0, V_pad - V)))
        blm = jnp.pad(blm, ((0, 0), (0, V_pad - V)))

    logits_flat = pl.pallas_call(
        _lm_head_kernel,
        out_shape=jax.ShapeDtypeStruct((M_pad, V_pad), jnp.float32),
        grid=(V_pad // tv, M_pad // tm),               # vocab OUTER, rows inner:
        in_specs=[                                     # wlm block re-fetched only
            pl.BlockSpec((tm, H), lambda j, i: (i, 0)),   # when the outer index
            pl.BlockSpec((H, tv), lambda j, i: (0, j)),   # changes -> streamed once.
            pl.BlockSpec((1, tv), lambda j, i: (0, j)),
        ],
        out_specs=pl.BlockSpec((tm, tv), lambda j, i: (i, j)),
        compiler_params=pltpu.CompilerParams(
            dimension_semantics=("parallel", "arbitrary"),
            vmem_limit_bytes=_VMEM_LIMIT,
        ),
    )(attn_flat, wlm_t, blm)

    logits = logits_flat[:M, :V].reshape(B, T, V)
    return logits, hidden_states, rnn_outputs


# ---------------------------------------------------------------------------
# Pure-JAX reference (mirrors the PyTorch module exactly, all f32)
# ---------------------------------------------------------------------------
def rnn_lm_reference(tokens, params):
    emb = jnp.take(params["embed"], tokens, axis=0)      # (B, T, E)
    B, T, _ = emb.shape
    H = params["wi"].shape[0]

    hs, ys = [], []
    h = jnp.zeros((B, H), jnp.float32)
    for t in range(T):
        x = emb[:, t, :]
        h = jax.nn.relu(x @ params["wi"].T + params["bi"][0]
                        + h @ params["wh"].T + params["bh"][0])
        y = h @ params["wro"].T + params["bro"][0]
        hs.append(h)
        ys.append(y)
    hidden_states = jnp.stack(hs, axis=1)                # (B, T, H)
    rnn_outputs = jnp.stack(ys, axis=1)                  # (B, T, H)

    key_dim = params["wq"].shape[0]
    scale = key_dim ** 0.5
    q = (rnn_outputs @ params["wq"].T + params["bq"][0]) / scale
    k = rnn_outputs @ params["wk"].T + params["bk"][0]
    v = rnn_outputs @ params["wv"].T + params["bv"][0]
    scores = jnp.einsum("bqk,bsk->bqs", q, k)
    mask = jnp.tril(jnp.ones((T, T), bool))[None]
    scores = jnp.where(mask, scores, -jnp.inf)
    weights = jax.nn.softmax(scores, axis=-1)
    attn = jnp.einsum("bqs,bsv->bqv", weights, v)
    attn_out = attn @ params["wao"].T + params["bao"][0]
    logits = attn_out @ params["wlm"].T + params["blm"][0]
    return logits, hidden_states, rnn_outputs


# ---------------------------------------------------------------------------
# Deterministic parameter init (nn.Linear shapes: (out, in) weights)
# ---------------------------------------------------------------------------
def init_params(key, vocab_size, embed_dim, hidden_dim, key_dim, value_dim):
    ks = jax.random.split(key, 20)
    s = 0.1

    def w(k, shape):
        return jax.random.normal(k, shape, jnp.float32) * s

    return {
        "embed": w(ks[0], (vocab_size, embed_dim)),
        # RNNCell
        "wi": w(ks[1], (hidden_dim, embed_dim)),  "bi": w(ks[2], (1, hidden_dim)),
        "wh": w(ks[3], (hidden_dim, hidden_dim)), "bh": w(ks[4], (1, hidden_dim)),
        # RNN output linear
        "wro": w(ks[5], (hidden_dim, hidden_dim)), "bro": w(ks[6], (1, hidden_dim)),
        # SelfAttention
        "wq": w(ks[7], (key_dim, hidden_dim)),    "bq": w(ks[8], (1, key_dim)),
        "wk": w(ks[9], (key_dim, hidden_dim)),    "bk": w(ks[10], (1, key_dim)),
        "wv": w(ks[11], (value_dim, hidden_dim)), "bv": w(ks[12], (1, value_dim)),
        "wao": w(ks[13], (hidden_dim, value_dim)), "bao": w(ks[14], (1, hidden_dim)),
        # LM head
        "wlm": w(ks[15], (vocab_size, hidden_dim)), "blm": w(ks[16], (1, vocab_size)),
    }


if __name__ == "__main__":
    B, T = 2, 8
    embed_dim, hidden_dim = 32, 32
    key_dim, value_dim = 32, 32
    vocab_size = 64

    root = jax.random.PRNGKey(0)
    k_tok, k_par = jax.random.split(root)
    tokens = jax.random.randint(k_tok, (B, T), 0, vocab_size, dtype=jnp.int32)
    params = init_params(k_par, vocab_size, embed_dim, hidden_dim, key_dim, value_dim)

    logits, hidden_states, rnn_outputs = jax.block_until_ready(
        jax.jit(rnn_lm_forward)(tokens, params)
    )

    # Correctness check against pure-JAX f32 reference of the PyTorch module.
    ref_logits, ref_hs, ref_ys = rnn_lm_reference(tokens, params)
    assert logits.shape == (B, T, vocab_size)
    assert hidden_states.shape == (B, T, hidden_dim)
    assert rnn_outputs.shape == (B, T, hidden_dim)
    # bf16 MXU inputs on the hoisted projections (wh/h kept f32) -> ~1e-3 error.
    assert jnp.allclose(hidden_states, ref_hs, atol=1e-2, rtol=1e-2)
    assert jnp.allclose(rnn_outputs, ref_ys, atol=1e-2, rtol=1e-2)
    # Attention / LM head fully bf16 on the MXU + approx-reciprocal softmax
    # + bf16 attention output -> slightly looser.
    assert jnp.allclose(logits, ref_logits, atol=2e-2, rtol=2e-2)

    print("KERNEL_OK")
</pallas_src>

<mosaic_0001>
module attributes {stable_mosaic.version = 11 : i64} {
  func.func @_rnn_kernel(%arg0: i32, %arg1: memref<8x2x32xf32, #tpu.memory_space<vmem>>, %arg2: memref<32x32xbf16, #tpu.memory_space<vmem>>, %arg3: memref<32x32xf32, #tpu.memory_space<vmem>>, %arg4: memref<32x32xbf16, #tpu.memory_space<vmem>>, %arg5: memref<1x32xf32, #tpu.memory_space<vmem>>, %arg6: memref<1x32xf32, #tpu.memory_space<vmem>>, %arg7: memref<2x8x32xf32, #tpu.memory_space<vmem>>, %arg8: memref<2x8x32xf32, #tpu.memory_space<vmem>>, %arg9: memref<8x2x32xf32, #tpu.memory_space<vmem>>) attributes {dimension_semantics = [#tpu.dimension_semantics<parallel>], iteration_bounds = array<i64: 1>, scalar_prefetch = 0 : i64, scratch_operands = 1 : i64, tpu.core_type = #tpu.core_type<tc>, window_params = [{transform_indices = @transform_0, window_bounds = array<i64: 8, 2, 32>}, {pipeline_mode = #tpu.pipeline_mode<synchronous>, transform_indices = @transform_1, window_bounds = array<i64: 32, 32>}, {pipeline_mode = #tpu.pipeline_mode<synchronous>, transform_indices = @transform_2, window_bounds = array<i64: 32, 32>}, {pipeline_mode = #tpu.pipeline_mode<synchronous>, transform_indices = @transform_3, window_bounds = array<i64: 32, 32>}, {pipeline_mode = #tpu.pipeline_mode<synchronous>, transform_indices = @transform_4, window_bounds = array<i64: 1, 32>}, {pipeline_mode = #tpu.pipeline_mode<synchronous>, transform_indices = @transform_5, window_bounds = array<i64: 1, 32>}, {transform_indices = @transform_6, window_bounds = array<i64: 2, 8, 32>}, {transform_indices = @transform_7, window_bounds = array<i64: 2, 8, 32>}]} {
    %c0 = arith.constant 0 : index
    %c0_0 = arith.constant 0 : index
    %c0_1 = arith.constant 0 : index
    %0 = vector.load %arg1[%c0, %c0_0, %c0_1] : memref<8x2x32xf32, #tpu.memory_space<vmem>>, vector<8x2x32xf32>
    %1 = vector.shape_cast %0 : vector<8x2x32xf32> to vector<16x32xf32>
    %2 = arith.truncf %1 : vector<16x32xf32> to vector<16x32xbf16>
    %c0_2 = arith.constant 0 : index
    %c0_3 = arith.constant 0 : index
    %3 = vector.load %arg2[%c0_2, %c0_3] : memref<32x32xbf16, #tpu.memory_space<vmem>>, vector<32x32xbf16>
    %cst = arith.constant dense<0.000000e+00> : vector<16x32xf32>
    %4 = tpu.matmul %2, %3, %cst {dimension_numbers = #tpu.dot_dimension_numbers<[1], [0], [0], [1], [0, 0, 1, 1], [], []>} : vector<16x32xbf16>, vector<32x32xbf16>, vector<16x32xf32> -> vector<16x32xf32>
    %c0_4 = arith.constant 0 : index
    %c0_5 = arith.constant 0 : index
    %5 = vector.load %arg5[%c0_4, %c0_5] : memref<1x32xf32, #tpu.memory_space<vmem>>, vector<1x32xf32>
    %6 = vector.broadcast %5 : vector<1x32xf32> to vector<16x32xf32>
    %7 = arith.addf %4, %6 : vector<16x32xf32>
    %8 = vector.shape_cast %7 : vector<16x32xf32> to vector<8x2x32xf32>
    %c0_6 = arith.constant 0 : index
    %c0_7 = arith.constant 0 : index
    %c0_8 = arith.constant 0 : index
    %9 = vector.load %arg9[%c0_6, %c0_7, %c0_8] : memref<8x2x32xf32, #tpu.memory_space<vmem>>, vector<8x2x32xf32>
    tpu.vector_store %arg9[%c0_6, %c0_7, %c0_8], %8 {strides = array<i32>} : memref<8x2x32xf32, #tpu.memory_space<vmem>>, vector<8x2x32xf32>,
    %c0_9 = arith.constant 0 : index
    %c0_10 = arith.constant 0 : index
    %10 = vector.load %arg3[%c0_9, %c0_10] : memref<32x32xf32, #tpu.memory_space<vmem>>, vector<32x32xf32>
    %cst_11 = arith.constant 0.000000e+00 : f32
    %11 = vector.broadcast %cst_11 : f32 to vector<2x32xf32>
    %c0_i32 = arith.constant 0 : i32
    %12 = arith.index_cast %c0_i32 : i32 to index
    %c0_12 = arith.constant 0 : index
    %c0_13 = arith.constant 0 : index
    %13 = vector.load %arg9[%12, %c0_12, %c0_13] : memref<8x2x32xf32, #tpu.memory_space<vmem>>, vector<1x2x32xf32>
    %14 = vector.shape_cast %13 : vector<1x2x32xf32> to vector<2x32xf32>
    %cst_14 = arith.constant dense<0.000000e+00> : vector<2x32xf32>
    %15 = tpu.matmul %11, %10, %cst_14 {dimension_numbers = #tpu.dot_dimension_numbers<[1], [0], [0], [1], [0, 0, 1, 1], [], []>} : vector<2x32xf32>, vector<32x32xf32>, vector<2x32xf32> -> vector<2x32xf32>
    %16 = arith.addf %14, %15 : vector<2x32xf32>
    %cst_15 = arith.constant 0.000000e+00 : f32
    %17 = vector.broadcast %cst_15 : f32 to vector<2x32xf32>
    %18 = arith.maximumf %16, %17 : vector<2x32xf32>
    %19 = arith.index_cast %c0_i32 : i32 to index
    %c0_16 = arith.constant 0 : index
    %c0_17 = arith.constant 0 : index
    %20 = vector.load %arg9[%19, %c0_16, %c0_17] : memref<8x2x32xf32, #tpu.memory_space<vmem>>, vector<1x2x32xf32>
    %21 = vector.shape_cast %20 : vector<1x2x32xf32> to vector<2x32xf32>
    %22 = vector.shape_cast %18 : vector<2x32xf32> to vector<1x2x32xf32>
    tpu.vector_store %arg9[%19, %c0_16, %c0_17], %22 {strides = array<i32>} : memref<8x2x32xf32, #tpu.memory_space<vmem>>, vector<1x2x32xf32>,
    %c1_i32 = arith.constant 1 : i32
    %23 = arith.index_cast %c1_i32 : i32 to index
    %c0_18 = arith.constant 0 : index
    %c0_19 = arith.constant 0 : index
    %24 = vector.load %arg9[%23, %c0_18, %c0_19] : memref<8x2x32xf32, #tpu.memory_space<vmem>>, vector<1x2x32xf32>
    %25 = vector.shape_cast %24 : vector<1x2x32xf32> to vector<2x32xf32>
    %cst_20 = arith.constant dense<0.000000e+00> : vector<2x32xf32>
    %26 = tpu.matmul %18, %10, %cst_20 {dimension_numbers = #tpu.dot_dimension_numbers<[1], [0], [0], [1], [0, 0, 1, 1], [], []>} : vector<2x32xf32>, vector<32x32xf32>, vector<2x32xf32> -> vector<2x32xf32>
    %27 = arith.addf %25, %26 : vector<2x32xf32>
    %cst_21 = arith.constant 0.000000e+00 : f32
    %28 = vector.broadcast %cst_21 : f32 to vector<2x32xf32>
    %29 = arith.maximumf %27, %28 : vector<2x32xf32>
    %30 = arith.index_cast %c1_i32 : i32 to index
    %c0_22 = arith.constant 0 : index
    %c0_23 = arith.constant 0 : index
    %31 = vector.load %arg9[%30, %c0_22, %c0_23] : memref<8x2x32xf32, #tpu.memory_space<vmem>>, vector<1x2x32xf32>
    %32 = vector.shape_cast %31 : vector<1x2x32xf32> to vector<2x32xf32>
    %33 = vector.shape_cast %29 : vector<2x32xf32> to vector<1x2x32xf32>
    tpu.vector_store %arg9[%30, %c0_22, %c0_23], %33 {strides = array<i32>} : memref<8x2x32xf32, #tpu.memory_space<vmem>>, vector<1x2x32xf32>,
    %c2_i32 = arith.constant 2 : i32
    %34 = arith.index_cast %c2_i32 : i32 to index
    %c0_24 = arith.constant 0 : index
    %c0_25 = arith.constant 0 : index
    %35 = vector.load %arg9[%34, %c0_24, %c0_25] : memref<8x2x32xf32, #tpu.memory_space<vmem>>, vector<1x2x32xf32>
    %36 = vector.shape_cast %35 : vector<1x2x32xf32> to vector<2x32xf32>
    %cst_26 = arith.constant dense<0.000000e+00> : vector<2x32xf32>
    %37 = tpu.matmul %29, %10, %cst_26 {dimension_numbers = #tpu.dot_dimension_numbers<[1], [0], [0], [1], [0, 0, 1, 1], [], []>} : vector<2x32xf32>, vector<32x32xf32>, vector<2x32xf32> -> vector<2x32xf32>
    %38 = arith.addf %36, %37 : vector<2x32xf32>
    %cst_27 = arith.constant 0.000000e+00 : f32
    %39 = vector.broadcast %cst_27 : f32 to vector<2x32xf32>
    %40 = arith.maximumf %38, %39 : vector<2x32xf32>
    %41 = arith.index_cast %c2_i32 : i32 to index
    %c0_28 = arith.constant 0 : index
    %c0_29 = arith.constant 0 : index
    %42 = vector.load %arg9[%41, %c0_28, %c0_29] : memref<8x2x32xf32, #tpu.memory_space<vmem>>, vector<1x2x32xf32>
    %43 = vector.shape_cast %42 : vector<1x2x32xf32> to vector<2x32xf32>
    %44 = vector.shape_cast %40 : vector<2x32xf32> to vector<1x2x32xf32>
    tpu.vector_store %arg9[%41, %c0_28, %c0_29], %44 {strides = array<i32>} : memref<8x2x32xf32, #tpu.memory_space<vmem>>, vector<1x2x32xf32>,
    %c3_i32 = arith.constant 3 : i32
    %45 = arith.index_cast %c3_i32 : i32 to index
    %c0_30 = arith.constant 0 : index
    %c0_31 = arith.constant 0 : index
    %46 = vector.load %arg9[%45, %c0_30, %c0_31] : memref<8x2x32xf32, #tpu.memory_space<vmem>>, vector<1x2x32xf32>
    %47 = vector.shape_cast %46 : vector<1x2x32xf32> to vector<2x32xf32>
    %cst_32 = arith.constant dense<0.000000e+00> : vector<2x32xf32>
    %48 = tpu.matmul %40, %10, %cst_32 {dimension_numbers = #tpu.dot_dimension_numbers<[1], [0], [0], [1], [0, 0, 1, 1], [], []>} : vector<2x32xf32>, vector<32x32xf32>, vector<2x32xf32> -> vector<2x32xf32>
    %49 = arith.addf %47, %48 : vector<2x32xf32>
    %cst_33 = arith.constant 0.000000e+00 : f32
    %50 = vector.broadcast %cst_33 : f32 to vector<2x32xf32>
    %51 = arith.maximumf %49, %50 : vector<2x32xf32>
    %52 = arith.index_cast %c3_i32 : i32 to index
    %c0_34 = arith.constant 0 : index
    %c0_35 = arith.constant 0 : index
    %53 = vector.load %arg9[%52, %c0_34, %c0_35] : memref<8x2x32xf32, #tpu.memory_space<vmem>>, vector<1x2x32xf32>
    %54 = vector.shape_cast %53 : vector<1x2x32xf32> to vector<2x32xf32>
    %55 = vector.shape_cast %51 : vector<2x32xf32> to vector<1x2x32xf32>
    tpu.vector_store %arg9[%52, %c0_34, %c0_35], %55 {strides = array<i32>} : memref<8x2x32xf32, #tpu.memory_space<vmem>>, vector<1x2x32xf32>,
    %c4_i32 = arith.constant 4 : i32
    %56 = arith.index_cast %c4_i32 : i32 to index
    %c0_36 = arith.constant 0 : index
    %c0_37 = arith.constant 0 : index
    %57 = vector.load %arg9[%56, %c0_36, %c0_37] : memref<8x2x32xf32, #tpu.memory_space<vmem>>, vector<1x2x32xf32>
    %58 = vector.shape_cast %57 : vector<1x2x32xf32> to vector<2x32xf32>
    %cst_38 = arith.constant dense<0.000000e+00> : vector<2x32xf32>
    %59 = tpu.matmul %51, %10, %cst_38 {dimension_numbers = #tpu.dot_dimension_numbers<[1], [0], [0], [1], [0, 0, 1, 1], [], []>} : vector<2x32xf32>, vector<32x32xf32>, vector<2x32xf32> -> vector<2x32xf32>
    %60 = arith.addf %58, %59 : vector<2x32xf32>
    %cst_39 = arith.constant 0.000000e+00 : f32
    %61 = vector.broadcast %cst_39 : f32 to vector<2x32xf32>
    %62 = arith.maximumf %60, %61 : vector<2x32xf32>
    %63 = arith.index_cast %c4_i32 : i32 to index
    %c0_40 = arith.constant 0 : index
    %c0_41 = arith.constant 0 : index
    %64 = vector.load %arg9[%63, %c0_40, %c0_41] : memref<8x2x32xf32, #tpu.memory_space<vmem>>, vector<1x2x32xf32>
    %65 = vector.shape_cast %64 : vector<1x2x32xf32> to vector<2x32xf32>
    %66 = vector.shape_cast %62 : vector<2x32xf32> to vector<1x2x32xf32>
    tpu.vector_store %arg9[%63, %c0_40, %c0_41], %66 {strides = array<i32>} : memref<8x2x32xf32, #tpu.memory_space<vmem>>, vector<1x2x32xf32>,
    %c5_i32 = arith.constant 5 : i32
    %67 = arith.index_cast %c5_i32 : i32 to index
    %c0_42 = arith.constant 0 : index
    %c0_43 = arith.constant 0 : index
    %68 = vector.load %arg9[%67, %c0_42, %c0_43] : memref<8x2x32xf32, #tpu.memory_space<vmem>>, vector<1x2x32xf32>
    %69 = vector.shape_cast %68 : vector<1x2x32xf32> to vector<2x32xf32>
    %cst_44 = arith.constant dense<0.000000e+00> : vector<2x32xf32>
    %70 = tpu.matmul %62, %10, %cst_44 {dimension_numbers = #tpu.dot_dimension_numbers<[1], [0], [0], [1], [0, 0, 1, 1], [], []>} : vector<2x32xf32>, vector<32x32xf32>, vector<2x32xf32> -> vector<2x32xf32>
    %71 = arith.addf %69, %70 : vector<2x32xf32>
    %cst_45 = arith.constant 0.000000e+00 : f32
    %72 = vector.broadcast %cst_45 : f32 to vector<2x32xf32>
    %73 = arith.maximumf %71, %72 : vector<2x32xf32>
    %74 = arith.index_cast %c5_i32 : i32 to index
    %c0_46 = arith.constant 0 : index
    %c0_47 = arith.constant 0 : index
    %75 = vector.load %arg9[%74, %c0_46, %c0_47] : memref<8x2x32xf32, #tpu.memory_space<vmem>>, vector<1x2x32xf32>
    %76 = vector.shape_cast %75 : vector<1x2x32xf32> to vector<2x32xf32>
    %77 = vector.shape_cast %73 : vector<2x32xf32> to vector<1x2x32xf32>
    tpu.vector_store %arg9[%74, %c0_46, %c0_47], %77 {strides = array<i32>} : memref<8x2x32xf32, #tpu.memory_space<vmem>>, vector<1x2x32xf32>,
    %c6_i32 = arith.constant 6 : i32
    %78 = arith.index_cast %c6_i32 : i32 to index
    %c0_48 = arith.constant 0 : index
    %c0_49 = arith.constant 0 : index
    %79 = vector.load %arg9[%78, %c0_48, %c0_49] : memref<8x2x32xf32, #tpu.memory_space<vmem>>, vector<1x2x32xf32>
    %80 = vector.shape_cast %79 : vector<1x2x32xf32> to vector<2x32xf32>
    %cst_50 = arith.constant dense<0.000000e+00> : vector<2x32xf32>
    %81 = tpu.matmul %73, %10, %cst_50 {dimension_numbers = #tpu.dot_dimension_numbers<[1], [0], [0], [1], [0, 0, 1, 1], [], []>} : vector<2x32xf32>, vector<32x32xf32>, vector<2x32xf32> -> vector<2x32xf32>
    %82 = arith.addf %80, %81 : vector<2x32xf32>
    %cst_51 = arith.constant 0.000000e+00 : f32
    %83 = vector.broadcast %cst_51 : f32 to vector<2x32xf32>
    %84 = arith.maximumf %82, %83 : vector<2x32xf32>
    %85 = arith.index_cast %c6_i32 : i32 to index
    %c0_52 = arith.constant 0 : index
    %c0_53 = arith.constant 0 : index
    %86 = vector.load %arg9[%85, %c0_52, %c0_53] : memref<8x2x32xf32, #tpu.memory_space<vmem>>, vector<1x2x32xf32>
    %87 = vector.shape_cast %86 : vector<1x2x32xf32> to vector<2x32xf32>
    %88 = vector.shape_cast %84 : vector<2x32xf32> to vector<1x2x32xf32>
    tpu.vector_store %arg9[%85, %c0_52, %c0_53], %88 {strides = array<i32>} : memref<8x2x32xf32, #tpu.memory_space<vmem>>, vector<1x2x32xf32>,
    %c7_i32 = arith.constant 7 : i32
    %89 = arith.index_cast %c7_i32 : i32 to index
    %c0_54 = arith.constant 0 : index
    %c0_55 = arith.constant 0 : index
    %90 = vector.load %arg9[%89, %c0_54, %c0_55] : memref<8x2x32xf32, #tpu.memory_space<vmem>>, vector<1x2x32xf32>
    %91 = vector.shape_cast %90 : vector<1x2x32xf32> to vector<2x32xf32>
    %cst_56 = arith.constant dense<0.000000e+00> : vector<2x32xf32>
    %92 = tpu.matmul %84, %10, %cst_56 {dimension_numbers = #tpu.dot_dimension_numbers<[1], [0], [0], [1], [0, 0, 1, 1], [], []>} : vector<2x32xf32>, vector<32x32xf32>, vector<2x32xf32> -> vector<2x32xf32>
    %93 = arith.addf %91, %92 : vector<2x32xf32>
    %cst_57 = arith.constant 0.000000e+00 : f32
    %94 = vector.broadcast %cst_57 : f32 to vector<2x32xf32>
    %95 = arith.maximumf %93, %94 : vector<2x32xf32>
    %96 = arith.index_cast %c7_i32 : i32 to index
    %c0_58 = arith.constant 0 : index
    %c0_59 = arith.constant 0 : index
    %97 = vector.load %arg9[%96, %c0_58, %c0_59] : memref<8x2x32xf32, #tpu.memory_space<vmem>>, vector<1x2x32xf32>
    %98 = vector.shape_cast %97 : vector<1x2x32xf32> to vector<2x32xf32>
    %99 = vector.shape_cast %95 : vector<2x32xf32> to vector<1x2x32xf32>
    tpu.vector_store %arg9[%96, %c0_58, %c0_59], %99 {strides = array<i32>} : memref<8x2x32xf32, #tpu.memory_space<vmem>>, vector<1x2x32xf32>,
    %c8_i32 = arith.constant 8 : i32
    %c0_60 = arith.constant 0 : index
    %c0_61 = arith.constant 0 : index
    %c0_62 = arith.constant 0 : index
    %100 = vector.load %arg9[%c0_60, %c0_61, %c0_62] : memref<8x2x32xf32, #tpu.memory_space<vmem>>, vector<8x2x32xf32>
    %101 = tpu.transpose %100, [1, 0, 2] : vector<8x2x32xf32> -> vector<2x8x32xf32>
    %c0_63 = arith.constant 0 : index
    %c0_64 = arith.constant 0 : index
    %c0_65 = arith.constant 0 : index
    %102 = vector.load %arg7[%c0_63, %c0_64, %c0_65] : memref<2x8x32xf32, #tpu.memory_space<vmem>>, vector<2x8x32xf32>
    tpu.vector_store %arg7[%c0_63, %c0_64, %c0_65], %101 {strides = array<i32>} : memref<2x8x32xf32, #tpu.memory_space<vmem>>, vector<2x8x32xf32>,
    %103 = vector.shape_cast %101 : vector<2x8x32xf32> to vector<16x32xf32>
    %104 = arith.truncf %103 : vector<16x32xf32> to vector<16x32xbf16>
    %c0_66 = arith.constant 0 : index
    %c0_67 = arith.constant 0 : index
    %105 = vector.load %arg4[%c0_66, %c0_67] : memref<32x32xbf16, #tpu.memory_space<vmem>>, vector<32x32xbf16>
    %cst_68 = arith.constant dense<0.000000e+00> : vector<16x32xf32>
    %106 = tpu.matmul %104, %105, %cst_68 {dimension_numbers = #tpu.dot_dimension_numbers<[1], [0], [0], [1], [0, 0, 1, 1], [], []>} : vector<16x32xbf16>, vector<32x32xbf16>, vector<16x32xf32> -> vector<16x32xf32>
    %c0_69 = arith.constant 0 : index
    %c0_70 = arith.constant 0 : index
    %107 = vector.load %arg6[%c0_69, %c0_70] : memref<1x32xf32, #tpu.memory_space<vmem>>, vector<1x32xf32>
    %108 = vector.broadcast %107 : vector<1x32xf32> to vector<16x32xf32>
    %109 = arith.addf %106, %108 : vector<16x32xf32>
    %110 = vector.shape_cast %109 : vector<16x32xf32> to vector<2x8x32xf32>
    %c0_71 = arith.constant 0 : index
    %c0_72 = arith.constant 0 : index
    %c0_73 = arith.constant 0 : index
    %111 = vector.load %arg8[%c0_71, %c0_72, %c0_73] : memref<2x8x32xf32, #tpu.memory_space<vmem>>, vector<2x8x32xf32>
    tpu.vector_store %arg8[%c0_71, %c0_72, %c0_73], %110 {strides = array<i32>} : memref<2x8x32xf32, #tpu.memory_space<vmem>>, vector<2x8x32xf32>,
    return
  }
  func.func @transform_0(%arg0: i32) -> (i32, i32, i32) {
    %c0_i32 = arith.constant 0 : i32
    %c0_i32_0 = arith.constant 0 : i32
    %c0_i32_1 = arith.constant 0 : i32
    return %c0_i32, %arg0, %c0_i32_0 : i32, i32, i32
  }
  func.func @transform_1(%arg0: i32) -> (i32, i32) {
    %c0_i32 = arith.constant 0 : i32
    %c0_i32_0 = arith.constant 0 : i32
    %c0_i32_1 = arith.constant 0 : i32
    return %c0_i32, %c0_i32_0 : i32, i32
  }
  func.func @transform_2(%arg0: i32) -> (i32, i32) {
    %c0_i32 = arith.constant 0 : i32
    %c0_i32_0 = arith.constant 0 : i32
    %c0_i32_1 = arith.constant 0 : i32
    return %c0_i32, %c0_i32_0 : i32, i32
  }
  func.func @transform_3(%arg0: i32) -> (i32, i32) {
    %c0_i32 = arith.constant 0 : i32
    %c0_i32_0 = arith.constant 0 : i32
    %c0_i32_1 = arith.constant 0 : i32
    return %c0_i32, %c0_i32_0 : i32, i32
  }
  func.func @transform_4(%arg0: i32) -> (i32, i32) {
    %c0_i32 = arith.constant 0 : i32
    %c0_i32_0 = arith.constant 0 : i32
    %c0_i32_1 = arith.constant 0 : i32
    return %c0_i32, %c0_i32_0 : i32, i32
  }
  func.func @transform_5(%arg0: i32) -> (i32, i32) {
    %c0_i32 = arith.constant 0 : i32
    %c0_i32_0 = arith.constant 0 : i32
    %c0_i32_1 = arith.constant 0 : i32
    return %c0_i32, %c0_i32_0 : i32, i32
  }
  func.func @transform_6(%arg0: i32) -> (i32, i32, i32) {
    %c0_i32 = arith.constant 0 : i32
    %c0_i32_0 = arith.constant 0 : i32
    %c0_i32_1 = arith.constant 0 : i32
    return %arg0, %c0_i32, %c0_i32_0 : i32, i32, i32
  }
  func.func @transform_7(%arg0: i32) -> (i32, i32, i32) {
    %c0_i32 = arith.constant 0 : i32
    %c0_i32_0 = arith.constant 0 : i32
    %c0_i32_1 = arith.constant 0 : i32
    return %arg0, %c0_i32, %c0_i32_0 : i32, i32, i32
  }
}

module attributes {stable_mosaic.version = 11 : i64} {
  func.func @_attn_kernel(%arg0: i32, %arg1: memref<1x8x32xf32, #tpu.memory_space<vmem>>, %arg2: memref<32x32xbf16, #tpu.memory_space<vmem>>, %arg3: memref<1x32xf32, #tpu.memory_space<vmem>>, %arg4: memref<32x32xbf16, #tpu.memory_space<vmem>>, %arg5: memref<1x32xf32, #tpu.memory_space<vmem>>, %arg6: memref<32x32xbf16, #tpu.memory_space<vmem>>, %arg7: memref<1x32xf32, #tpu.memory_space<vmem>>, %arg8: memref<32x32xbf16, #tpu.memory_space<vmem>>, %arg9: memref<1x32xf32, #tpu.memory_space<vmem>>, %arg10: memref<1x8x32xbf16, #tpu.memory_space<vmem>>) attributes {dimension_semantics = [#tpu.dimension_semantics<parallel>], iteration_bounds = array<i64: 2>, scalar_prefetch = 0 : i64, scratch_operands = 0 : i64, tpu.core_type = #tpu.core_type<tc>, window_params = [{transform_indices = @transform_0, window_bounds = array<i64: 1, 8, 32>}, {pipeline_mode = #tpu.pipeline_mode<synchronous>, transform_indices = @transform_1, window_bounds = array<i64: 32, 32>}, {pipeline_mode = #tpu.pipeline_mode<synchronous>, transform_indices = @transform_2, window_bounds = array<i64: 1, 32>}, {pipeline_mode = #tpu.pipeline_mode<synchronous>, transform_indices = @transform_3, window_bounds = array<i64: 32, 32>}, {pipeline_mode = #tpu.pipeline_mode<synchronous>, transform_indices = @transform_4, window_bounds = array<i64: 1, 32>}, {pipeline_mode = #tpu.pipeline_mode<synchronous>, transform_indices = @transform_5, window_bounds = array<i64: 32, 32>}, {pipeline_mode = #tpu.pipeline_mode<synchronous>, transform_indices = @transform_6, window_bounds = array<i64: 1, 32>}, {pipeline_mode = #tpu.pipeline_mode<synchronous>, transform_indices = @transform_7, window_bounds = array<i64: 32, 32>}, {pipeline_mode = #tpu.pipeline_mode<synchronous>, transform_indices = @transform_8, window_bounds = array<i64: 1, 32>}, {transform_indices = @transform_9, window_bounds = array<i64: 1, 8, 32>}]} {
    %c0 = arith.constant 0 : index
    %c0_0 = arith.constant 0 : index
    %c0_1 = arith.constant 0 : index
    %0 = vector.load %arg1[%c0, %c0_0, %c0_1] : memref<1x8x32xf32, #tpu.memory_space<vmem>>, vector<1x8x32xf32>
    %1 = vector.shape_cast %0 : vector<1x8x32xf32> to vector<8x32xf32>
    %2 = arith.truncf %1 : vector<8x32xf32> to vector<8x32xbf16>
    %c0_2 = arith.constant 0 : index
    %c0_3 = arith.constant 0 : index
    %3 = vector.load %arg2[%c0_2, %c0_3] : memref<32x32xbf16, #tpu.memory_space<vmem>>, vector<32x32xbf16>
    %cst = arith.constant dense<0.000000e+00> : vector<8x32xf32>
    %4 = tpu.matmul %2, %3, %cst {dimension_numbers = #tpu.dot_dimension_numbers<[1], [0], [0], [1], [0, 0, 1, 1], [], []>} : vector<8x32xbf16>, vector<32x32xbf16>, vector<8x32xf32> -> vector<8x32xf32>
    %c0_4 = arith.constant 0 : index
    %c0_5 = arith.constant 0 : index
    %5 = vector.load %arg3[%c0_4, %c0_5] : memref<1x32xf32, #tpu.memory_space<vmem>>, vector<1x32xf32>
    %6 = vector.broadcast %5 : vector<1x32xf32> to vector<8x32xf32>
    %7 = arith.addf %4, %6 : vector<8x32xf32>
    %cst_6 = arith.constant 0.176776692 : f32
    %8 = vector.broadcast %cst_6 : f32 to vector<8x32xf32>
    %9 = arith.mulf %7, %8 : vector<8x32xf32>
    %c0_7 = arith.constant 0 : index
    %c0_8 = arith.constant 0 : index
    %10 = vector.load %arg4[%c0_7, %c0_8] : memref<32x32xbf16, #tpu.memory_space<vmem>>, vector<32x32xbf16>
    %cst_9 = arith.constant dense<0.000000e+00> : vector<8x32xf32>
    %11 = tpu.matmul %2, %10, %cst_9 {dimension_numbers = #tpu.dot_dimension_numbers<[1], [0], [0], [1], [0, 0, 1, 1], [], []>} : vector<8x32xbf16>, vector<32x32xbf16>, vector<8x32xf32> -> vector<8x32xf32>
    %c0_10 = arith.constant 0 : index
    %c0_11 = arith.constant 0 : index
    %12 = vector.load %arg5[%c0_10, %c0_11] : memref<1x32xf32, #tpu.memory_space<vmem>>, vector<1x32xf32>
    %13 = vector.broadcast %12 : vector<1x32xf32> to vector<8x32xf32>
    %14 = arith.addf %11, %13 : vector<8x32xf32>
    %c0_12 = arith.constant 0 : index
    %c0_13 = arith.constant 0 : index
    %15 = vector.load %arg6[%c0_12, %c0_13] : memref<32x32xbf16, #tpu.memory_space<vmem>>, vector<32x32xbf16>
    %cst_14 = arith.constant dense<0.000000e+00> : vector<8x32xf32>
    %16 = tpu.matmul %2, %15, %cst_14 {dimension_numbers = #tpu.dot_dimension_numbers<[1], [0], [0], [1], [0, 0, 1, 1], [], []>} : vector<8x32xbf16>, vector<32x32xbf16>, vector<8x32xf32> -> vector<8x32xf32>
    %c0_15 = arith.constant 0 : index
    %c0_16 = arith.constant 0 : index
    %17 = vector.load %arg7[%c0_15, %c0_16] : memref<1x32xf32, #tpu.memory_space<vmem>>, vector<1x32xf32>
    %18 = vector.broadcast %17 : vector<1x32xf32> to vector<8x32xf32>
    %19 = arith.addf %16, %18 : vector<8x32xf32>
    %20 = vector.shape_cast %9 : vector<8x32xf32> to vector<1x8x32xf32>
    %21 = arith.truncf %20 : vector<1x8x32xf32> to vector<1x8x32xbf16>
    %22 = vector.shape_cast %14 : vector<8x32xf32> to vector<1x8x32xf32>
    %23 = arith.truncf %22 : vector<1x8x32xf32> to vector<1x8x32xbf16>
    %24 = vector.shape_cast %19 : vector<8x32xf32> to vector<1x8x32xf32>
    %25 = arith.truncf %24 : vector<1x8x32xf32> to vector<1x8x32xbf16>
    "tpu.trace_start"() <{level = 10 : i32, message = "btk,bsk->bts"}> : () -> ()
    %cst_17 = arith.constant dense<0.000000e+00> : vector<1x8x8xf32>
    %26 = tpu.matmul %21, %23, %cst_17 {dimension_numbers = #tpu.dot_dimension_numbers<[2], [2], [1], [1], [0, 0, 0, 1, 1, 1], [0], [0]>} : vector<1x8x32xbf16>, vector<1x8x32xbf16>, vector<1x8x8xf32> -> vector<1x8x8xf32>
    "tpu.trace_stop"() : () -> ()
    %27 = tpu.iota {dimensions = array<i32: 1>} : vector<1x8x8xi32>
    %28 = tpu.iota {dimensions = array<i32: 2>} : vector<1x8x8xi32>
    %29 = arith.cmpi sle, %28, %27 : vector<1x8x8xi32>
    %cst_18 = arith.constant 0xFF800000 : f32
    %30 = vector.broadcast %cst_18 : f32 to vector<1x8x8xf32>
    %31 = arith.select %29, %26, %30 : vector<1x8x8xi1>, vector<1x8x8xf32>
    %cst_19 = arith.constant dense<0xFF800000> : vector<1x8xf32>
    %32 = vector.multi_reduction <maximumf>, %31, %cst_19 [2] : vector<1x8x8xf32> to vector<1x8xf32>
    %33 = vector.shape_cast %32 : vector<1x8xf32> to vector<1x8x1xf32>
    %34 = vector.broadcast %33 : vector<1x8x1xf32> to vector<1x8x8xf32>
    %35 = arith.subf %31, %34 : vector<1x8x8xf32>
    %36 = math.exp %35 : vector<1x8x8xf32>
    %cst_20 = arith.constant dense<0.000000e+00> : vector<1x8xf32>
    %37 = vector.multi_reduction <add>, %36, %cst_20 [2] : vector<1x8x8xf32> to vector<1x8xf32>
    %38 = vector.shape_cast %37 : vector<1x8xf32> to vector<1x8x1xf32>
    %39 = tpu.reciprocal %38 {approx = true} : vector<1x8x1xf32> -> vector<1x8x1xf32>
    %40 = vector.broadcast %39 : vector<1x8x1xf32> to vector<1x8x8xf32>
    %41 = arith.mulf %36, %40 : vector<1x8x8xf32>
    %42 = arith.truncf %41 : vector<1x8x8xf32> to vector<1x8x8xbf16>
    "tpu.trace_start"() <{level = 10 : i32, message = "bts,bsv->btv"}> : () -> ()
    %cst_21 = arith.constant dense<0.000000e+00> : vector<1x8x32xf32>
    %43 = tpu.matmul %42, %25, %cst_21 {dimension_numbers = #tpu.dot_dimension_numbers<[2], [1], [1], [2], [0, 0, 0, 1, 1, 2], [0], [0]>} : vector<1x8x8xbf16>, vector<1x8x32xbf16>, vector<1x8x32xf32> -> vector<1x8x32xf32>
    "tpu.trace_stop"() : () -> ()
    %44 = vector.shape_cast %43 : vector<1x8x32xf32> to vector<8x32xf32>
    %45 = arith.truncf %44 : vector<8x32xf32> to vector<8x32xbf16>
    %c0_22 = arith.constant 0 : index
    %c0_23 = arith.constant 0 : index
    %46 = vector.load %arg8[%c0_22, %c0_23] : memref<32x32xbf16, #tpu.memory_space<vmem>>, vector<32x32xbf16>
    %cst_24 = arith.constant dense<0.000000e+00> : vector<8x32xf32>
    %47 = tpu.matmul %45, %46, %cst_24 {dimension_numbers = #tpu.dot_dimension_numbers<[1], [0], [0], [1], [0, 0, 1, 1], [], []>} : vector<8x32xbf16>, vector<32x32xbf16>, vector<8x32xf32> -> vector<8x32xf32>
    %c0_25 = arith.constant 0 : index
    %c0_26 = arith.constant 0 : index
    %48 = vector.load %arg9[%c0_25, %c0_26] : memref<1x32xf32, #tpu.memory_space<vmem>>, vector<1x32xf32>
    %49 = vector.broadcast %48 : vector<1x32xf32> to vector<8x32xf32>
    %50 = arith.addf %47, %49 : vector<8x32xf32>
    %51 = vector.shape_cast %50 : vector<8x32xf32> to vector<1x8x32xf32>
    %52 = arith.truncf %51 : vector<1x8x32xf32> to vector<1x8x32xbf16>
    %c0_27 = arith.constant 0 : index
    %c0_28 = arith.constant 0 : index
    %c0_29 = arith.constant 0 : index
    %53 = vector.load %arg10[%c0_27, %c0_28, %c0_29] : memref<1x8x32xbf16, #tpu.memory_space<vmem>>, vector<1x8x32xbf16>
    tpu.vector_store %arg10[%c0_27, %c0_28, %c0_29], %52 {strides = array<i32>} : memref<1x8x32xbf16, #tpu.memory_space<vmem>>, vector<1x8x32xbf16>,
    return
  }
  func.func @transform_0(%arg0: i32) -> (i32, i32, i32) {
    %c0_i32 = arith.constant 0 : i32
    %c0_i32_0 = arith.constant 0 : i32
    %c0_i32_1 = arith.constant 0 : i32
    return %arg0, %c0_i32, %c0_i32_0 : i32, i32, i32
  }
  func.func @transform_1(%arg0: i32) -> (i32, i32) {
    %c0_i32 = arith.constant 0 : i32
    %c0_i32_0 = arith.constant 0 : i32
    %c0_i32_1 = arith.constant 0 : i32
    return %c0_i32, %c0_i32_0 : i32, i32
  }
  func.func @transform_2(%arg0: i32) -> (i32, i32) {
    %c0_i32 = arith.constant 0 : i32
    %c0_i32_0 = arith.constant 0 : i32
    %c0_i32_1 = arith.constant 0 : i32
    return %c0_i32, %c0_i32_0 : i32, i32
  }
  func.func @transform_3(%arg0: i32) -> (i32, i32) {
    %c0_i32 = arith.constant 0 : i32
    %c0_i32_0 = arith.constant 0 : i32
    %c0_i32_1 = arith.constant 0 : i32
    return %c0_i32, %c0_i32_0 : i32, i32
  }
  func.func @transform_4(%arg0: i32) -> (i32, i32) {
    %c0_i32 = arith.constant 0 : i32
    %c0_i32_0 = arith.constant 0 : i32
    %c0_i32_1 = arith.constant 0 : i32
    return %c0_i32, %c0_i32_0 : i32, i32
  }
  func.func @transform_5(%arg0: i32) -> (i32, i32) {
    %c0_i32 = arith.constant 0 : i32
    %c0_i32_0 = arith.constant 0 : i32
    %c0_i32_1 = arith.constant 0 : i32
    return %c0_i32, %c0_i32_0 : i32, i32
  }
  func.func @transform_6(%arg0: i32) -> (i32, i32) {
    %c0_i32 = arith.constant 0 : i32
    %c0_i32_0 = arith.constant 0 : i32
    %c0_i32_1 = arith.constant 0 : i32
    return %c0_i32, %c0_i32_0 : i32, i32
  }
  func.func @transform_7(%arg0: i32) -> (i32, i32) {
    %c0_i32 = arith.constant 0 : i32
    %c0_i32_0 = arith.constant 0 : i32
    %c0_i32_1 = arith.constant 0 : i32
    return %c0_i32, %c0_i32_0 : i32, i32
  }
  func.func @transform_8(%arg0: i32) -> (i32, i32) {
    %c0_i32 = arith.constant 0 : i32
    %c0_i32_0 = arith.constant 0 : i32
    %c0_i32_1 = arith.constant 0 : i32
    return %c0_i32, %c0_i32_0 : i32, i32
  }
  func.func @transform_9(%arg0: i32) -> (i32, i32, i32) {
    %c0_i32 = arith.constant 0 : i32
    %c0_i32_0 = arith.constant 0 : i32
    %c0_i32_1 = arith.constant 0 : i32
    return %arg0, %c0_i32, %c0_i32_0 : i32, i32, i32
  }
}

module attributes {stable_mosaic.version = 11 : i64} {
  func.func @_lm_head_kernel(%arg0: i32, %arg1: i32, %arg2: memref<16x32xbf16, #tpu.memory_space<vmem>>, %arg3: memref<32x128xbf16, #tpu.memory_space<vmem>>, %arg4: memref<1x128xf32, #tpu.memory_space<vmem>>, %arg5: memref<16x128xf32, #tpu.memory_space<vmem>>) attributes {dimension_semantics = [#tpu.dimension_semantics<parallel>, #tpu.dimension_semantics<arbitrary>], iteration_bounds = array<i64: 1, 1>, scalar_prefetch = 0 : i64, scratch_operands = 0 : i64, tpu.core_type = #tpu.core_type<tc>, window_params = [{transform_indices = @transform_0, window_bounds = array<i64: 16, 32>}, {transform_indices = @transform_1, window_bounds = array<i64: 32, 128>}, {transform_indices = @transform_2, window_bounds = array<i64: 1, 128>}, {transform_indices = @transform_3, window_bounds = array<i64: 16, 128>}]} {
    %c0 = arith.constant 0 : index
    %c0_0 = arith.constant 0 : index
    %0 = vector.load %arg2[%c0, %c0_0] : memref<16x32xbf16, #tpu.memory_space<vmem>>, vector<16x32xbf16>
    %c0_1 = arith.constant 0 : index
    %c0_2 = arith.constant 0 : index
    %1 = vector.load %arg3[%c0_1, %c0_2] : memref<32x128xbf16, #tpu.memory_space<vmem>>, vector<32x128xbf16>
    %cst = arith.constant dense<0.000000e+00> : vector<16x128xf32>
    %2 = tpu.matmul %0, %1, %cst {dimension_numbers = #tpu.dot_dimension_numbers<[1], [0], [0], [1], [0, 0, 1, 1], [], []>} : vector<16x32xbf16>, vector<32x128xbf16>, vector<16x128xf32> -> vector<16x128xf32>
    %c0_3 = arith.constant 0 : index
    %c0_4 = arith.constant 0 : index
    %3 = vector.load %arg4[%c0_3, %c0_4] : memref<1x128xf32, #tpu.memory_space<vmem>>, vector<1x128xf32>
    %4 = vector.broadcast %3 : vector<1x128xf32> to vector<16x128xf32>
    %5 = arith.addf %2, %4 : vector<16x128xf32>
    %c0_5 = arith.constant 0 : index
    %c0_6 = arith.constant 0 : index
    %6 = vector.load %arg5[%c0_5, %c0_6] : memref<16x128xf32, #tpu.memory_space<vmem>>, vector<16x128xf32>
    tpu.vector_store %arg5[%c0_5, %c0_6], %5 {strides = array<i32>} : memref<16x128xf32, #tpu.memory_space<vmem>>, vector<16x128xf32>,
    return
  }
  func.func @transform_0(%arg0: i32, %arg1: i32) -> (i32, i32) {
    %c0_i32 = arith.constant 0 : i32
    %c0_i32_0 = arith.constant 0 : i32
    return %arg1, %c0_i32 : i32, i32
  }
  func.func @transform_1(%arg0: i32, %arg1: i32) -> (i32, i32) {
    %c0_i32 = arith.constant 0 : i32
    %c0_i32_0 = arith.constant 0 : i32
    return %c0_i32, %arg0 : i32, i32
  }
  func.func @transform_2(%arg0: i32, %arg1: i32) -> (i32, i32) {
    %c0_i32 = arith.constant 0 : i32
    %c0_i32_0 = arith.constant 0 : i32
    return %c0_i32, %arg0 : i32, i32
  }
  func.func @transform_3(%arg0: i32, %arg1: i32) -> (i32, i32) {
    %c0_i32 = arith.constant 0 : i32
    return %arg1, %arg0 : i32, i32
  }
}

</mosaic_0001>

<bundles_post_ra>
// kernel: rnn_lm_forward.5
= control target key start
LH: loop header
LB: loop body
LE: loop exit
PB: predicated region body
PF: predicated region fallthrough
CT: control target
= control target key end

     0   :  { %v117_v0 = vmov 0.0   ;;  %vm118_vm0 = vmmov 0   ;;  %vm45_vm1 = vcmask 261120   ;;  %s157_s1 = inlined_call_operand.vmem [shape: bf16[32,128], index: 1, kind: input, shape index: {}]   ;;  %s158_s0 = inlined_call_operand.vmem [shape: bf16[16,32], index: 0, kind: input, shape index: {}]   ;;  %s159_s2 = inlined_call_operand.vmem [shape: f32[1,128], index: 2, kind: input, shape index: {}]   ;;  %s160_s3 = inlined_call_operand.vmem [shape: f32[16,128], index: 3, kind: output, shape index: {}]  }
   0x1   :  { %104 = vmatprep.subr.bf16.mxu0 %v117_v0  ;;  %v114_v1 = vld [vmem:[%s157_s1] sm:$0xff]   ;;  %108 = vmatprep.mubr.msk.bf16.mxu0 %vm118_vm0, %v117_v0  ;;  %v115_v2 = vld [vmem:[%s157_s1 + $0x8] sm:$0xff]  }
   0x2   :  { %105 = vmatpush3.bf16.msra.mxu0 %v114_v1  ;;  %v116_v3 = vld [vmem:[%s158_s0] sm:$0xff]  }
   0x3   :  { %106 = vmatprep.subr.bf16.mxu0 %v117_v0  ;;  %v96_v4 = vld [vmem:[%s159_s2] ss:$0 sm:$0xff] }
   0x6   :  { %107 = vmatpush3.bf16.msra.mxu0 %v115_v2 }
   0x9   :  { %109 = vmatmul.mubr.msk.bf16.vlgmr.msra.gmra.mrb[0].mxu0 %vm45_vm1, %v116_v3 }
  0xdc   :  { %v83_v5 = vpop.f32.mrb[0].mxu0 }
  0xdd   :  { %v84_v6 = vadd.f32 %v96_v4, %v83_v5  ;;  %v110_v7 = vpop.f32.mrb[1].mxu0 }
  0xde   :  { %v86_v8 = vpop.f32.mrb[2].mxu0 }
  0xdf   :  { %90 = vst [vmem:[%s160_s3] sm:$0xff] %v84_v6  ;;  %v87_v9 = vadd.f32 %v96_v4, %v86_v8  ;;  %v111_v10 = vpop.f32.mrb[3].mxu0 }
  0xe1   :  { %91 = vst [vmem:[%s160_s3 + $0x8] sm:$0xff] %v87_v9 }

// kernel: rnn_lm_forward.4
= control target key start
LH: loop header
LB: loop body
LE: loop exit
PB: predicated region body
PF: predicated region fallthrough
CT: control target
= control target key end

     0   :  { %s932_s30 = smov 0   ;;  %s1020_s0 = inlined_call_operand.vmem [shape: f32[2,8,32], index: 0, kind: input, shape index: {}]   ;;  %s1021_s1 = inlined_call_operand.vmem [shape: bf16[32,32], index: 1, kind: input, shape index: {}]   ;;  %s1022_s2 = inlined_call_operand.vmem [shape: f32[1,32], index: 2, kind: input, shape index: {}]   ;;  %s1023_s3 = inlined_call_operand.vmem [shape: bf16[32,32], index: 3, kind: input, shape index: {}]   ;;  %s1024_s4 = inlined_call_operand.vmem [shape: f32[1,32], index: 4, kind: input, shape index: {}]   ;;  %s1025_s5 = inlined_call_operand.vmem [shape: bf16[32,32], index: 5, kind: input, shape index: {}]   ;;  %s1026_s6 = inlined_call_operand.vmem [shape: f32[1,32], index: 6, kind: input, shape index: {}]   ;;  %s1027_s7 = inlined_call_operand.vmem [shape: bf16[32,32], index: 7, kind: input, shape index: {}]   ;;  %s1028_s8 = inlined_call_operand.vmem [shape: f32[1,32], index: 8, kind: input, shape index: {}]   ;;  %s1029_s9 = inlined_call_operand.vmem [shape: bf16[2,8,32], index: 9, kind: output, shape index: {}]  }
   0x1 LB: > { %s763_s10 = sadd.s32 4294967295, %s878_s30   ;;  %p767_p0 = scmp.ge.s32.totalorder %s878_s30, 1  ;;  %s878_s30 = sphi %s932_s30, %s19_s30  }
   0x2   : > { %p286_p1 = scmp.lt.s32.totalorder %s878_s30, 3 }
   0x4   : > { %p287_p2 = pnand %p767_p0, %p286_p1 }
   0x5   : > { %v860_v0 = vld [vmem:[%s1023_s3] sm:$0xff] (!%p287_p2)   ;;  %v880_v1 = vmov (!%p287_p2), 0.0   ;;  %v862_v3 = vld [vmem:[%s1023_s3 + $0x8] sm:$0xff] (!%p287_p2)   ;;  %vm881_vm0 = vmmov (!%p287_p2), 0   ;;  %p320_p3 = scmp.lt.s32.totalorder (!%p287_p2), %s763_s10, 1  ;;  %vm354_vm1 = vcmask (!%p287_p2), 261120   ;;  %v574_v25 = vlaneseq (!%p287_p2) }
   0x6   : > { %290 = sbr.rel (%p287_p2) target bundleno = 1203 (0x4b3), region = 56  ;;  %814 = vmatprep.subr.bf16.mxu1 (!%p287_p2), %v880_v1  ;;  %806 = vmatprep.subr.bf16.mxu0 (!%p287_p2), %v880_v1  ;;  %v861_v2 = vld [vmem:[%s1021_s1] sm:$0xff] (!%p287_p2)   ;;  %v863_v4 = vld [vmem:[%s1021_s1 + $0x8] sm:$0xff] (!%p287_p2)   ;;  %vm580_vm3 = vcmask (!%p287_p2), 64512   ;;  %vm596_vm4 = vcmask (!%p287_p2), 1043456   ;;  %vm708_vm5 = vcmask (!%p287_p2), 257024  }
   0x7   : > { %815 = vmatpush3.bf16.msra.mxu1 (!%p287_p2), %v860_v0  ;;  %818 = vmatprep.mubr.msk.bf16.mxu1 (!%p287_p2), %vm881_vm0, %v880_v1  ;;  %v774_v7 = vld [vmem:[%s1024_s4] ss:$0 sm:$0xff] (!%p287_p2)  ;;  %v865_v24 = vld [vmem:[%s1025_s5 + $0x8] sm:$0xff] (!%p287_p2)   ;;  %v575_v26 = vshrl.u32 (!%p287_p2), %v574_v25, 7  ;;  %v577_v27 = vand.u32 (!%p287_p2), 127, %v574_v25 }
   0x8   : > { %816 = vmatprep.subr.bf16.mxu1 (!%p287_p2), %v880_v1  ;;  %807 = vmatpush3.bf16.msra.mxu0 (!%p287_p2), %v861_v2  ;;  %v770_v8 = vld [vmem:[%s1022_s2] ss:$0 sm:$0xff] (!%p287_p2)  ;;  %v867_v52 = vld [vmem:[%s1027_s7 + $0x8] sm:$0xff] (!%p287_p2)  }
   0x9   : > { %808 = vmatprep.subr.bf16.mxu0 (!%p287_p2), %v880_v1  ;;  %810 = vmatprep.mubr.msk.bf16.mxu0 (!%p287_p2), %vm881_vm0, %v880_v1  ;;  %v864_v23 = vld [vmem:[%s1025_s5] sm:$0xff] (!%p287_p2)   ;;  %vm578_vm2 = vcmp.le.s32.totalorder (!%p287_p2), %v577_v27, %v575_v26 }
   0xa   : > { %v778_v42 = vld [vmem:[%s1026_s6] ss:$0 sm:$0xff] (!%p287_p2) }
   0xb   : > { %817 = vmatpush3.bf16.msra.mxu1 (!%p287_p2), %v862_v3  ;;  %v866_v47 = vld [vmem:[%s1027_s7] sm:$0xff] (!%p287_p2)  }
   0xc   : > { %809 = vmatpush3.bf16.msra.mxu0 (!%p287_p2), %v863_v4  ;;  %830 = vmatprep.subr.bf16.mxu1 (!%p287_p2), %v880_v1  ;;  %v784_v58 = vld [vmem:[%s1028_s8] ss:$0 sm:$0xff] (!%p287_p2) }
   0xd   : > { %s1031_s10 = smov (!%p320_p3, %s763_s10), 1  ;;  %822 = vmatprep.subr.bf16.mxu0 %v880_v1 }
   0xe   : > { %s768_s19 = sshll.u32 %s1031_s10, 3  ;;  %s769_s20 = sshll.u32 %s1031_s10, 2 }
   0xf   : > { %s323_s22 = scalar_lea.vmem %s1020_s0, %s768_s19  ;;  %s327_s23 = scalar_lea.vmem %s1029_s9, %s769_s20 }
  0x10   : > { %v329_v5 = vld [vmem:[%s323_s22] sm:$0xff] }
  0x11   : > { %v330_v6 = vpack.c.bf16 %v329_v5, %v329_v5 }
  0x13   : > { %819 = vmatmul.mubr.msk.bf16.vlgmr.msra.gmra.mrb[0].mxu1 %vm354_vm1, %v330_v6  ;;  %811 = vmatmul.mubr.msk.bf16.vlgmr.msra.gmra.mrb[0].mxu0 %vm354_vm1, %v330_v6 }
  0x14   : > { %832 = vmatprep.mubr.msk.bf16.mxu1 %vm881_vm0, %v880_v1  ;;  %826 = vmatprep.mubr.msk.bf16.mxu0 %vm881_vm0, %v880_v1 }
  0x15   : > { %823 = vmatpush3.bf16.msra.mxu0 %v864_v23 }
  0x16   : > { %824 = vmatprep.subr.bf16.mxu0 %v880_v1 }
  0x19   : > { %825 = vmatpush3.bf16.msra.mxu0 %v865_v24 }
  0x1a   : > { %836 = vmatprep.subr.bf16.mxu0 %v880_v1 }
  0x1c   : > { %827 = vmatmul.mubr.msk.bf16.vlgmr.msra.gmra.mrb[4].mxu0 %vm354_vm1, %v330_v6 }
  0x1d   : > { %838 = vmatprep.mubr.msk.bf16.mxu0 %vm881_vm0, %v880_v1 }
  0xe6   : > { %v456_v9 = vpop.f32.mrb[0].mxu1  ;;  %v392_v10 = vpop.f32.mrb[0].mxu0 }
  0xe7   : > { %v457_v11 = vadd.f32 %v774_v7, %v456_v9  ;;  %v820_v12 = vpop.f32.mrb[1].mxu1  ;;  %v393_v13 = vadd.f32 %v770_v8, %v392_v10  ;;  %v812_v14 = vpop.f32.mrb[1].mxu0 }
  0xe8   : > { %v459_v15 = vpop.f32.mrb[2].mxu1  ;;  %v395_v16 = vpop.f32.mrb[2].mxu0 }
  0xe9   : > { %v526_v17 = vpack.c.bf16 %v457_v11, %v457_v11  ;;  %v821_v18 = vpop.f32.mrb[3].mxu1  ;;  %v813_v19 = vpop.f32.mrb[3].mxu0  ;;  %v398_v21 = vmul.f32 0.17677669, %v393_v13 }
  0xeb   : > { %v532_v20 = vsel %vm354_vm1, %v526_v17, 0  ;;  %v525_v22 = vpack.c.bf16 %v398_v21, %v398_v21 }
  0xec   : > { %831 = vmatpush3.bf16.xpose.msra.mxu1 %v532_v20 }
  0xed   : > { %842 = vmatprep.subr.bf16.mxu1 %v880_v1 }
  0xef   : > { %v519_v39 = vpop.f32.mrb[4].mxu0 }
  0xf0   : > { %v828_v40 = vpop.f32.mrb[5].mxu0  ;;  %v520_v44 = vadd.f32 %v778_v42, %v519_v39 }
  0xf1   : > { %v522_v41 = vpop.f32.mrb[6].mxu0 }
  0xf2   : > { %v829_v43 = vpop.f32.mrb[7].mxu0  ;;  %v527_v45 = vpack.c.bf16 %v520_v44, %v520_v44 }
  0xf3   : > { %833 = vmatmul.mubr.msk.bf16.vlgmr.msra.gmra.mrb[4].mxu1 %vm354_vm1, %v525_v22 }
  0xf4   : > { %846 = vmatprep.mubr.msk.bf16.mxu1 %vm881_vm0, %v880_v1  ;;  %v598_v46 = vsel %vm596_vm4, %v527_v45, 0  ;;  %843 = vmatpush3.bf16.msra.mxu1 %v866_v47 }
  0xf5   : > { %837 = vmatpush3.bf16.msra.mxu0 %v598_v46  ;;  %844 = vmatprep.subr.bf16.mxu1 %v880_v1 }
  0xf8   : > { %845 = vmatpush3.bf16.msra.mxu1 %v867_v52 }
 0x1c6   : > { %v568_v28 = vpop.f32.mrb[4].mxu1 }
 0x1c7   : > { %v579_v29 = vsel %vm578_vm2, %v568_v28, -inf  ;;  %v834_v30 = vpop.f32.mrb[5].mxu1 }
 0x1c8   : > { %v571_v31 = vpop.f32.mrb[6].mxu1  ;;  %v581_v32 = vsel %vm580_vm3, %v579_v29, -inf }
 0x1c9   : > { %582 = vmax.xlane.f32.xlu0 %v581_v32  ;;  %v835_v33 = vpop.f32.mrb[7].mxu1 }
 0x256   : > { %v583_v34 = vpop.xlane.xlu0 %582 }
 0x257   : > { %v584_v35 = vsub.f32 %v579_v29, %v583_v34 }
 0x259   : > { %v585_v36 = vmul.f32 1.442695, %v584_v35 }
 0x25b   : > { %868 = vpow2.f32 %v585_v36 }
 0x265   : > { %v869_v37 = vpop.eup %868 }
 0x266   : > { %v587_v38 = vsel %vm580_vm3, %v869_v37, 0.0 }
 0x267   : > { %588 = vadd.xlane.f32.xlu0 %v587_v38 }
 0x2f4   : > { %v589_v48 = vpop.xlane.xlu0 %588 }
 0x2f5   : > { %870 = vrcp.f32 %v589_v48 }
 0x2ff   : > { %v871_v49 = vpop.eup %870 }
 0x300   : > { %v591_v50 = vmul.f32 %v871_v49, %v869_v37 }
 0x302   : > { %v592_v51 = vpack.c.bf16 %v591_v50, %v591_v50 }
 0x304   : > { %839 = vmatmul.mubr.msk.bf16.vlgmr.msra.gmra.mrb[8].mxu0 %vm580_vm3, %v592_v51 }
 0x3d7   : > { %v634_v53 = vpop.f32.mrb[8].mxu0 }
 0x3d8   : > { %v640_v54 = vpack.c.bf16 %v634_v53, %v634_v53  ;;  %v840_v55 = vpop.f32.mrb[9].mxu0 }
 0x3d9   : > { %v637_v56 = vpop.f32.mrb[10].mxu0 }
 0x3da   : > { %v841_v57 = vpop.f32.mrb[11].mxu0  ;;  %847 = vmatmul.mubr.msk.bf16.vlgmr.msra.gmra.mrb[8].mxu1 %vm354_vm1, %v640_v54 }
 0x4ad   : > { %v701_v59 = vpop.f32.mrb[8].mxu1 }
 0x4ae   : > { %v702_v60 = vadd.f32 %v784_v58, %v701_v59  ;;  %v848_v61 = vpop.f32.mrb[9].mxu1 }
 0x4af   : > { %v704_v62 = vpop.f32.mrb[10].mxu1 }
 0x4b0   : > { %v707_v63 = vpack.c.bf16 %v702_v60, %v702_v60  ;;  %v849_v0 = vpop.f32.mrb[11].mxu1 }
 0x4b2   : > { %709 = vst.msk [vmem:[%s327_s23] sm:$0xf] %vm708_vm5, %v707_v63 }
 0x4b3 PF: > { %s19_s30 = sadd.s32 1, %s878_s30  }
 0x4b4   : > { %p16_p4 = scmp.ge.s32.totalorder %s19_s30, 4  }
 0x4b6   :  { %18 = sbr.rel (!%p16_p4) target bundleno = 1 (0x1), region = 86 }

// kernel: rnn_lm_forward.3
= control target key start
LH: loop header
LB: loop body
LE: loop exit
PB: predicated region body
PF: predicated region fallthrough
CT: control target
= control target key end

     0   :  { %v1235_v1 = vmov 0.0   ;;  %v48_v3 = vlaneseq  ;;  %vm1236_vm0 = vmmov 0   ;;  %v1237_v12 = vmov 1983009808   ;;  %s1449_s0 = inlined_call_operand.vmem [shape: f32[8,2,32], index: 0, kind: input, shape index: {}]   ;;  %s1450_s1 = inlined_call_operand.vmem [shape: bf16[32,32], index: 1, kind: input, shape index: {}]   ;;  %s1451_s2 = inlined_call_operand.vmem [shape: f32[32,32], index: 2, kind: input, shape index: {}]   ;;  %s1452_s3 = inlined_call_operand.vmem [shape: bf16[32,32], index: 3, kind: input, shape index: {}]   ;;  %s1453_s4 = inlined_call_operand.vmem [shape: f32[1,32], index: 4, kind: input, shape index: {}]   ;;  %s1454_s5 = inlined_call_operand.vmem [shape: f32[1,32], index: 5, kind: input, shape index: {}]   ;;  %s1455_s6 = inlined_call_operand.hbm [shape: f32[2,8,32], index: 6, kind: output, shape index: {0}]   ;;  %s1456_s7 = inlined_call_operand.vmem [shape: f32[2,8,32], index: 7, kind: output, shape index: {1}]  }
   0x1   :  { %v1199_v0 = vld [vmem:[%s1450_s1] sm:$0xff]   ;;  %1039 = vmatprep.subr.bf16.mxu0 %v1235_v1  ;;  %v1200_v2 = vld [vmem:[%s1450_s1 + $0x8] sm:$0xff]   ;;  %1043 = vmatprep.mubr.msk.bf16.mxu0 %vm1236_vm0, %v1235_v1  ;;  %v46_v13 = vunpack.c.l.s4 %v1237_v12  ;;  %v203_v17 = vld [vmem:[%s1451_s2 + $0x10] sm:$0xff]  ;;  %v1238_v25 = vmov 0.0|0.0  }
   0x2   :  { %1040 = vmatpush3.bf16.msra.mxu0 %v1199_v0  ;;  %v27_v4 = vld [vmem:[%s1449_s0] sm:$0x3]  ;;  %v28_v5 = vld [vmem:[%s1449_s0 + $0x2] sm:$0x3]  ;;  %v29_v6 = vld [vmem:[%s1449_s0 + $0x4] sm:$0x3]  ;;  %1055 = vmatprep.mubr.msk.f32.mxu1 %vm1236_vm0, %v1235_v1 }
   0x3   :  { %1041 = vmatprep.subr.bf16.mxu0 %v1235_v1  ;;  %v30_v7 = vld [vmem:[%s1449_s0 + $0x6] sm:$0x3]  ;;  %v31_v8 = vld [vmem:[%s1449_s0 + $0x8] sm:$0x3]  ;;  %v32_v9 = vld [vmem:[%s1449_s0 + $0xa] sm:$0x3]  ;;  %v43_v18 = vcombine.low %v27_v4, %v28_v5  ;;  %v47_v22 = vunpack.c.0.s8 %v46_v13  ;;  %1143 = vmatprep.subr.bf16.mxu1 %v1238_v25 }
   0x4   :  { %v33_v10 = vld [vmem:[%s1449_s0 + $0xc] sm:$0x3]  ;;  %v34_v11 = vld [vmem:[%s1449_s0 + $0xe] sm:$0x3]  ;;  %v1319_v14 = vshrl.u32 %v48_v3, 7  ;;  %v201_v15 = vld [vmem:[%s1451_s2] sm:$0xff]  ;;  %v44_v21 = vcombine.low %v29_v6, %v30_v7  ;;  %v60_v23 = vcombine.low %v31_v8, %v32_v9 }
   0x5   :  { %v202_v16 = vld [vmem:[%s1451_s2 + $0x8] sm:$0xff]  ;;  %v204_v20 = vld [vmem:[%s1451_s2 + $0x18] sm:$0xff]  ;;  %v61_v24 = vcombine.low %v33_v10, %v34_v11 }
   0x6   :  { %1042 = vmatpush3.bf16.msra.mxu0 %v1200_v2  ;;  %v1330_v19 = vpack.c.bf16 %v202_v16, %v201_v15  ;;  %v1338_v26 = vpack.c.bf16 %v204_v20, %v203_v17 }
   0x7   :  { %1149 = vmatprep.subr.bf16.mxu0 %v1238_v25 }
   0x8   :  { %1145 = vmatpush3.bf16.msra.mxu1 %v1330_v19 }
   0x9   :  { %13 = vsyncpa [#allocation4], 0  ;;  %v50_v27 = vsub.s32 %v47_v22, %v1319_v14  ;;  %1146 = vmatprep.subr.bf16.mxu1 %v1238_v25  ;;  %vm103_vm1 = vcmask 261120   ;;  %v978_v35 = vld [vmem:[%s1453_s4] ss:$0 sm:$0xff]  ;;  %vm192_vm2 = vcmask 254976  }
   0xb   :  { %v51_v28 = vrot.slane %v43_v18, %v50_v27  ;;  %v58_v29 = vrot.slane %v44_v21, %v50_v27  ;;  %v68_v30 = vrot.slane %v60_v23, %v50_v27  ;;  %v75_v31 = vrot.slane %v61_v24, %v50_v27 }
   0xc   :  { %1148 = vmatpush3.bf16.msra.mxu1 %v1338_v26 }
   0xd   :  { %v59_v32 = vcombine.low %v51_v28, %v58_v29  ;;  %v76_v33 = vcombine.low %v68_v30, %v75_v31  ;;  %1155 = vmatprep.subr.bf16.mxu1 %v1238_v25 }
   0xf   :  { %v79_v34 = vpack.c.bf16 %v76_v33, %v59_v32  ;;  %1056 = vmatmul.mubr.f32.vlgmr.msra.gmra.mrb[0].mxu1 %v1235_v1  ;;  %v1239_v33 = vmov 1934713408  }
  0x10   :  { %1157 = vmatpush3.bf16.msra.mxu1 %v1330_v19  ;;  %1077 = vmatprep.mubr.msk.f32.mxu1 %vm1236_vm0, %v1235_v1 }
  0x11   :  { %1044 = vmatmul.mubr.msk.bf16.vlgmr.msra.gmra.mrb[0].mxu0 %vm103_vm1, %v79_v34  ;;  %1158 = vmatprep.subr.bf16.mxu1 %v1238_v25  ;;  %v870_v34 = vunpack.c.l.s4 %v1239_v33 }
  0x12   :  { %1151 = vmatpush3.bf16.msra.mxu0 %v1330_v19  ;;  %1066 = vmatprep.mubr.msk.f32.mxu0 %vm1236_vm0, %v1235_v1 }
  0x13   :  { %1152 = vmatprep.subr.bf16.mxu0 %v1238_v25 }
  0x14   :  { %1160 = vmatpush3.bf16.msra.mxu1 %v1338_v26 }
  0x15   :  { %1167 = vmatprep.subr.bf16.mxu1 %v1238_v25 }
  0x16   :  { %1154 = vmatpush3.bf16.msra.mxu0 %v1338_v26 }
  0x17   :  { %1161 = vmatprep.subr.bf16.mxu0 %v1238_v25 }
  0xe2   :  { %v275_v36 = vpop.f32.mrb[0].mxu1 }
  0xe3   :  { %v1057_v37 = vpop.f32.mrb[1].mxu1 }
  0xe4   :  { %v141_v38 = vpop.f32.mrb[0].mxu0  ;;  %v871_v37 = vunpack.c.0.s8 %v870_v34 }
  0xe5   :  { %v142_v39 = vadd.f32 %v978_v35, %v141_v38  ;;  %v1045_v40 = vpop.f32.mrb[1].mxu0 }
  0xe6   :  { %v144_v41 = vpop.f32.mrb[2].mxu0  ;;  %v874_v40 = vsub.s32 %v871_v37, %v1319_v14 }
  0xe7   :  { %v150_v42 = vcombine.high %v142_v39, %v142_v39  ;;  %v157_v43 = vrot.slane %v142_v39, %v50_v27  ;;  %v145_v44 = vadd.f32 %v978_v35, %v144_v41  ;;  %v1046_v45 = vpop.f32.mrb[3].mxu0 }
  0xe9   :  { %v164_v46 = vrot.slane %v150_v42, %v50_v27  ;;  %v165_v47 = vcombine.high %v157_v43, %v157_v43  ;;  %193 = vst.msk [vmem:[#allocation2] sm:$0x3] %vm192_vm2, %v157_v43  ;;  %v167_v48 = vcombine.high %v145_v44, %v145_v44  ;;  %v174_v49 = vrot.slane %v145_v44, %v50_v27 }
  0xeb   :  { %v166_v50 = vcombine.high %v164_v46, %v164_v46  ;;  %194 = vst.msk [vmem:[#allocation2 + $0x2] sm:$0x3] %vm192_vm2, %v165_v47  ;;  %195 = vst.msk [vmem:[#allocation2 + $0x4] sm:$0x3] %vm192_vm2, %v164_v46  ;;  %v181_v51 = vrot.slane %v167_v48, %v50_v27  ;;  %v182_v52 = vcombine.high %v174_v49, %v174_v49 }
  0xec   :  { %197 = vst.msk [vmem:[#allocation2 + $0x8] sm:$0x3] %vm192_vm2, %v174_v49 }
  0xed   :  { %196 = vst.msk [vmem:[#allocation2 + $0x6] sm:$0x3] %vm192_vm2, %v166_v50  ;;  %v183_v53 = vcombine.high %v181_v51, %v181_v51  ;;  %198 = vst.msk [vmem:[#allocation2 + $0xa] sm:$0x3] %vm192_vm2, %v182_v52 }
  0xee   :  { %199 = vst.msk [vmem:[#allocation2 + $0xc] sm:$0x3] %vm192_vm2, %v181_v51 }
  0xef   :  { %200 = vst.msk [vmem:[#allocation2 + $0xe] sm:$0x3] %vm192_vm2, %v183_v53 }
  0xf0   :  { %v205_v54 = vld [vmem:[#allocation2] sm:$0x3] }
  0xf1   :  { %v279_v55 = vadd.f32 %v275_v36, %v205_v54 }
  0xf2   :  { %v283_v57 = vld [vmem:[#allocation2 + $0x2] sm:$0x3]  ;;  %v361_v62 = vld [vmem:[#allocation2 + $0x4] sm:$0x3] }
  0xf3   :  { %v280_v56 = vmax.f32 %v279_v55, 0.0  ;;  %v517_v9 = vld [vmem:[#allocation2 + $0x8] sm:$0x3] }
  0xf4   :  { %v439_v4 = vld [vmem:[#allocation2 + $0x6] sm:$0x3]  ;;  %v595_v15 = vld [vmem:[#allocation2 + $0xa] sm:$0x3] }
  0xf5   :  { %281 = vst.msk [vmem:[#allocation2] sm:$0x3] %vm192_vm2, %v280_v56  ;;  %1067 = vmatmul.mubr.msk.f32.vlgmr.msra.gmra.mrb[4].mxu0 %vm103_vm1, %v280_v56 }
  0xf6   :  { %1163 = vmatpush3.bf16.msra.mxu0 %v1330_v19  ;;  %1088 = vmatprep.mubr.msk.f32.mxu0 %vm1236_vm0, %v1235_v1  ;;  %v751_v27 = vld [vmem:[#allocation2 + $0xe] sm:$0x3] }
  0xf7   :  { %1164 = vmatprep.subr.bf16.mxu0 %v1238_v25 }
  0xfa   :  { %1166 = vmatpush3.bf16.msra.mxu0 %v1338_v26 }
  0xfb   :  { %1173 = vmatprep.subr.bf16.mxu0 %v1238_v25 }
 0x1c8   :  { %v353_v58 = vpop.f32.mrb[4].mxu0 }
 0x1c9   :  { %v357_v59 = vadd.f32 %v353_v58, %v283_v57  ;;  %v1068_v60 = vpop.f32.mrb[5].mxu0 }
 0x1cb   :  { %v358_v61 = vmax.f32 %v357_v59, 0.0 }
 0x1cd   :  { %359 = vst.msk [vmem:[#allocation2 + $0x2] sm:$0x3] %vm192_vm2, %v358_v61  ;;  %1078 = vmatmul.mubr.msk.f32.vlgmr.msra.gmra.mrb[2].mxu1 %vm103_vm1, %v358_v61 }
 0x1ce   :  { %1169 = vmatpush3.bf16.msra.mxu1 %v1330_v19  ;;  %1099 = vmatprep.mubr.msk.f32.mxu1 %vm1236_vm0, %v1235_v1 }
 0x1cf   :  { %1170 = vmatprep.subr.bf16.mxu1 %v1238_v25 }
 0x1d2   :  { %1172 = vmatpush3.bf16.msra.mxu1 %v1338_v26 }
 0x1d3   :  { %1179 = vmatprep.subr.bf16.mxu1 %v1238_v25 }
 0x2a0   :  { %v431_v63 = vpop.f32.mrb[2].mxu1 }
 0x2a1   :  { %v435_v0 = vadd.f32 %v431_v63, %v361_v62  ;;  %v1079_v2 = vpop.f32.mrb[3].mxu1 }
 0x2a3   :  { %v436_v3 = vmax.f32 %v435_v0, 0.0 }
 0x2a5   :  { %437 = vst.msk [vmem:[#allocation2 + $0x4] sm:$0x3] %vm192_vm2, %v436_v3  ;;  %1089 = vmatmul.mubr.msk.f32.vlgmr.msra.gmra.mrb[6].mxu0 %vm103_vm1, %v436_v3 }
 0x2a6   :  { %1175 = vmatpush3.bf16.msra.mxu0 %v1330_v19  ;;  %1110 = vmatprep.mubr.msk.f32.mxu0 %vm1236_vm0, %v1235_v1 }
 0x2a7   :  { %1176 = vmatprep.subr.bf16.mxu0 %v1238_v25 }
 0x2aa   :  { %1178 = vmatpush3.bf16.msra.mxu0 %v1338_v26 }
 0x2ab   :  { %1185 = vmatprep.subr.bf16.mxu0 %v1238_v25 }
 0x2ac   :  { %v1208_v35 = vld.sshfl [vmem:[#allocation2] sm:$0xf pattern:$0x76325410] }
 0x378   :  { %v509_v5 = vpop.f32.mrb[6].mxu0 }
 0x379   :  { %v513_v6 = vadd.f32 %v509_v5, %v439_v4  ;;  %v1090_v7 = vpop.f32.mrb[7].mxu0 }
 0x37b   :  { %v514_v8 = vmax.f32 %v513_v6, 0.0 }
 0x37d   :  { %515 = vst.msk [vmem:[#allocation2 + $0x6] sm:$0x3] %vm192_vm2, %v514_v8  ;;  %1100 = vmatmul.mubr.msk.f32.vlgmr.msra.gmra.mrb[4].mxu1 %vm103_vm1, %v514_v8 }
 0x37e   :  { %1181 = vmatpush3.bf16.msra.mxu1 %v1330_v19  ;;  %1121 = vmatprep.mubr.msk.f32.mxu1 %vm1236_vm0, %v1235_v1 }
 0x37f   :  { %1182 = vmatprep.subr.bf16.mxu1 %v1238_v25 }
 0x382   :  { %1184 = vmatpush3.bf16.msra.mxu1 %v1338_v26 }
 0x383   :  { %1135 = vmatprep.subr.bf16.mxu1 %v1235_v1 }
 0x384   :  { %v1207_v32 = vld.sshfl [vmem:[#allocation2 + $0x2] sm:$0xf pattern:$0x76325410] }
 0x385   :  { %v868_v39 = vcombine.low %v1208_v35, %v1207_v32 }
 0x450   :  { %v587_v10 = vpop.f32.mrb[4].mxu1 }
 0x451   :  { %v591_v11 = vadd.f32 %v587_v10, %v517_v9  ;;  %v1101_v12 = vpop.f32.mrb[5].mxu1 }
 0x453   :  { %v592_v13 = vmax.f32 %v591_v11, 0.0 }
 0x455   :  { %593 = vst.msk [vmem:[#allocation2 + $0x8] sm:$0x3] %vm192_vm2, %v592_v13  ;;  %1111 = vmatmul.mubr.msk.f32.vlgmr.msra.gmra.mrb[8].mxu0 %vm103_vm1, %v592_v13 }
 0x456   :  { %1187 = vmatpush3.bf16.msra.mxu0 %v1330_v19  ;;  %1132 = vmatprep.mubr.msk.f32.mxu0 %vm1236_vm0, %v1235_v1  ;;  %v673_v19 = vld [vmem:[#allocation2 + $0xc] sm:$0x3] }
 0x457   :  { %1188 = vmatprep.subr.bf16.mxu0 %v1238_v25  ;;  %v1201_v25 = vld [vmem:[%s1452_s3] sm:$0xff]  }
 0x45a   :  { %1190 = vmatpush3.bf16.msra.mxu0 %v1338_v26  ;;  %v1202_v26 = vld [vmem:[%s1452_s3 + $0x8] sm:$0xff]   ;;  %s1240_s3 = smov [#allocation3]  }
 0x45b   :  { %s963_s8 = sshll.u32 %s1240_s3, 4  ;;  %s964_s8 = int_to_ptr.vmem [resolvable:$true] %s963_s8 }
 0x45c   :  { %s1211_s9 = scalar_lea.vmem %s964_s8, 256  ;;  %p1216_p1 = scmp.lt.s32.totalorder %s964_s8, %s964_s8 }
 0x45d   :  { %p1212_p0 = scmp.ne.s32.totalorder %s964_s8, %s1211_s9  ;;  %p1217_p2 = scmp.lt.s32.totalorder %s1211_s9, %s1211_s9 }
 0x45f   :  { %p1218_p3 = por %p1217_p2, %p1216_p1 }
 0x461   :  { %p1219_p4 = pnand %p1218_p3, %p1212_p0 }
 0x528   :  { %v665_v16 = vpop.f32.mrb[8].mxu0 }
 0x529   :  { %v669_v17 = vadd.f32 %v665_v16, %v595_v15  ;;  %v1112_v18 = vpop.f32.mrb[9].mxu0 }
 0x52b   :  { %v670_v20 = vmax.f32 %v669_v17, 0.0 }
 0x52d   :  { %671 = vst.msk [vmem:[#allocation2 + $0xa] sm:$0x3] %vm192_vm2, %v670_v20  ;;  %1122 = vmatmul.mubr.msk.f32.vlgmr.msra.gmra.mrb[6].mxu1 %vm103_vm1, %v670_v20 }
 0x52e   :  { %1139 = vmatprep.mubr.msk.bf16.mxu1 %vm1236_vm0, %v1235_v1  ;;  %1136 = vmatpush3.bf16.msra.mxu1 %v1201_v25 }
 0x52f   :  { %1137 = vmatprep.subr.bf16.mxu1 %v1235_v1  ;;  %v875_v1 = vrot.slane %v868_v39, %v874_v40 }
 0x532   :  { %1138 = vmatpush3.bf16.msra.mxu1 %v1202_v26 }
 0x600   :  { %v743_v21 = vpop.f32.mrb[6].mxu1 }
 0x601   :  { %v747_v22 = vadd.f32 %v743_v21, %v673_v19  ;;  %v1123_v23 = vpop.f32.mrb[7].mxu1 }
 0x603   :  { %v748_v24 = vmax.f32 %v747_v22, 0.0 }
 0x605   :  { %749 = vst.msk [vmem:[#allocation2 + $0xc] sm:$0x3] %vm192_vm2, %v748_v24  ;;  %1133 = vmatmul.mubr.msk.f32.vlgmr.msra.gmra.mrb[10].mxu0 %vm103_vm1, %v748_v24 }
 0x60c   :  { %v1209_v36 = vld.sshfl [vmem:[#allocation2 + $0x8] sm:$0xf pattern:$0x76325410] }
 0x6d8   :  { %v821_v28 = vpop.f32.mrb[10].mxu0 }
 0x6d9   :  { %v825_v29 = vadd.f32 %v821_v28, %v751_v27  ;;  %v1134_v30 = vpop.f32.mrb[11].mxu0 }
 0x6db   :  { %v826_v31 = vmax.f32 %v825_v29, 0.0 }
 0x6dd   :  { %827 = vst.msk [vmem:[#allocation2 + $0xe] sm:$0x3] %vm192_vm2, %v826_v31 }
 0x6e4   :  { %v1210_v38 = vld.sshfl [vmem:[#allocation2 + $0xa] sm:$0xf pattern:$0x76325410] }
 0x6e5   :  { %v876_v41 = vcombine.low %v1209_v36, %v1210_v38 }
 0x6e7   :  { %v883_v42 = vrot.slane %v876_v41, %v874_v40 }
 0x6e9   :  { %v884_v43 = vcombine.low %v875_v1, %v883_v42  ;;  %v885_v44 = vcombine.high %v875_v1, %v883_v42 }
 0x6eb   :  { %v888_v45 = vpack.c.bf16 %v885_v44, %v884_v43  ;;  %886 = vst.msk [vmem:[#allocation3] sm:$0xff] %vm103_vm1, %v884_v43  ;;  %887 = vst.msk [vmem:[#allocation3 + $0x8] sm:$0xff] %vm103_vm1, %v885_v44 }
 0x6ed   :  { %1140 = vmatmul.mubr.msk.bf16.vlgmr.msra.gmra.mrb[8].mxu1 %vm103_vm1, %v888_v45 }
 0x6ee   :  { %1222 = shalt.err (!%p1219_p4)
}
 0x6ef   :  { %s1223_s11 = scalar_lea.hbm %s1455_s6, 256 }
 0x6f0   :  { %p1224_p5 = scmp.ne.s32.totalorder %s1455_s6, %s1223_s11  ;;  %p1227_p6 = scmp.lt.u32.totalorder %s1223_s11, %s1455_s6 }
 0x6f2   :  { %p1229_p7 = pnand %p1227_p6, %p1224_p5 }
 0x6f4   :  { %1232 = shalt.err (!%p1229_p7)
}
 0x6f5   :  { %s1241_s16 = smov 128   ;;  %s1242_s17 = smov 8   ;;  %v989_v14 = vld [vmem:[%s1454_s5] ss:$0 sm:$0xff] }
 0x6f6   :  { %969 = dma.vmem_to_hbm [thread:$0]  %s964_s8, 256, %s1455_s6, [#allocation4], %s1241_s16, %s1241_s16, %s1242_s17  }
 0x7c0   :  { %v949_v46 = vpop.f32.mrb[8].mxu1 }
 0x7c1   :  { %v950_v47 = vadd.f32 %v989_v14, %v949_v46  ;;  %v1141_v48 = vpop.f32.mrb[9].mxu1 }
 0x7c2   :  { %v952_v49 = vpop.f32.mrb[10].mxu1 }
 0x7c3   :  { %956 = vst.msk [vmem:[%s1456_s7] sm:$0xff] %vm103_vm1, %v950_v47  ;;  %v953_v50 = vadd.f32 %v989_v14, %v952_v49  ;;  %v1142_v51 = vpop.f32.mrb[11].mxu1 }
 0x7c5   :  { %957 = vst.msk [vmem:[%s1456_s7 + $0x8] sm:$0xff] %vm103_vm1, %v953_v50 }
 0x7c6   :  { %1233 = dma.done.wait [#allocation4], 256  }
 0x7c7   :  { %1234 = vsyncadd [#allocation4], 4294967040 }
 0x7c8   :  { %977 = vsyncpa [#allocation4], 1 }

</bundles_post_ra>
